<compile_context>
chip_gen: v5e
topology: v5e:2x2
jax: 0.10.0
libtpu: 0.0.40
codegen_flags: <defaults>
</compile_context>

<pallas_src>
import functools

import jax
import jax.numpy as jnp
from jax.experimental import pallas as pl
from jax.experimental.pallas import tpu as pltpu


def _round_up(n, m):
    return ((n + m - 1) // m) * m


# ---------------------------------------------------------------------------
# Pallas kernel: one batch element per grid step
# ---------------------------------------------------------------------------
def _upblock_kernel(x_ref, br_ref, upw_ref, upb_ref, spread_ref, mask_ref,
                    w1_ref, b1_ref, g1_ref, be1_ref,
                    w2_ref, b2_ref, g2_ref, be2_ref,
                    out_ref, cat_ref, stack_ref,
                    *, H, W, Cout, Cout_p, Cb_p, eps=1e-5):
    f32, bf16 = jnp.float32, jnp.bfloat16
    HW = H * W
    Ccat_p = Cb_p + Cout_p

    # ---- ConvTranspose2d(kernel=2, stride=2) --------------------------------
    # One stacked channel matmul (4*Cout_p, Cin_p) x (Cin_p, Hin*Win); the 4
    # tap slabs are then scattered into the (Cout_p, H*W) layout with small
    # precomputed one-hot spread matrices (exact 0/1 selection, built once in
    # the wrapper).  For large spatial sizes this scatter should become a
    # strided interleave, but at these sizes it is tiny.
    x = x_ref[0]                                                   # bf16 (Cin_p, HWs)
    zs = jnp.dot(upw_ref[...], x, preferred_element_type=f32)      # (4*Cout_p, HWs)
    up = jnp.zeros((Cout_p, HW), f32)
    for k in range(4):
        zk = zs[k * Cout_p:(k + 1) * Cout_p, :]
        up = up + jnp.dot(zk, spread_ref[k], preferred_element_type=f32)
    up = up + upb_ref[...]                                         # (Cout_p, 1) bcast

    # TODO(synk): the F.pad path (diffY/diffX != 0) is not implemented
    # in-kernel; the wrapper asserts the standard UNet case 2*Hin == H_bridge.

    # channel concat [bridge, up] -> f32 scratch (aligned sublane slices)
    cat_ref[0:Cb_p, :] = br_ref[0]
    cat_ref[Cb_p:Ccat_p, :] = up

    chmask = (jax.lax.broadcasted_iota(jnp.int32, (Cout_p, 1), 0)
              < Cout).astype(f32)
    inv_n = 1.0 / float(Cout * HW)

    def layernorm_relu(v, g, b):
        # LayerNorm over the real (Cout, H, W) slab (PyTorch semantics); the
        # padded channels are excluded from the statistics via chmask and are
        # zeroed afterwards by the zero-padded gamma/beta.
        mu = jnp.sum(v * chmask, keepdims=True) * inv_n
        d = (v - mu) * chmask
        var = jnp.sum(d * d, keepdims=True) * inv_n
        y = (v - mu) * jax.lax.rsqrt(var + eps) * g + b
        return jnp.maximum(y, 0.0)

    def build_tap_stack(src, c):
        # im2col on the channel axis: for each of the 9 taps write the rolled
        # + border-masked slab into the VMEM stack (bf16 for the MXU).  The
        # roll runs on the XLU and the mask multiply on the VPU, so the MXU
        # only sees a single big-K channel matmul per conv.
        for t in range(9):
            dy, dx = t // 3, t % 3
            off = (dy - 1) * W + (dx - 1)
            shifted = src if off == 0 else pltpu.roll(src, (-off) % HW, axis=1)
            masked = shifted if t == 4 else shifted * mask_ref[t]
            stack_ref[t * c:(t + 1) * c, :] = masked.astype(bf16)

    # ---- conv1: Conv2d(Cb+Cout -> Cout, 3x3, pad=1) on concat([bridge, up]) --
    build_tap_stack(cat_ref[...], Ccat_p)
    acc1 = jnp.dot(w1_ref[...], stack_ref[...], preferred_element_type=f32)
    h1 = layernorm_relu(acc1 + b1_ref[...], g1_ref[...], be1_ref[...])

    # ---- conv2: Conv2d(Cout -> Cout, 3x3, pad=1) -----------------------------
    build_tap_stack(h1, Cout_p)
    acc2 = jnp.dot(w2_ref[...], stack_ref[0:9 * Cout_p, :],
                   preferred_element_type=f32)
    h2 = layernorm_relu(acc2 + b2_ref[...], g2_ref[...], be2_ref[...])

    out_ref[0] = h2.astype(out_ref.dtype)


# ---------------------------------------------------------------------------
# wrapper: parameter repacking + pallas_call
# ---------------------------------------------------------------------------
def upblock_forward(x, bridge, params):
    B, Cin, Hin, Win = x.shape
    Bb, Cb, H, W = bridge.shape
    assert B == Bb
    diffY, diffX = H - 2 * Hin, W - 2 * Win
    assert diffY == 0 and diffX == 0, \
        "TODO(synk): non-zero F.pad case unsupported in-kernel"

    Cout = params['upw'].shape[1]
    SUB = 16                                   # bf16 sublane tile
    Cin_p, Cb_p, Cout_p = (_round_up(c, SUB) for c in (Cin, Cb, Cout))
    Ccat_p = Cb_p + Cout_p
    HWs, HW = Hin * Win, H * W
    f32, bf16 = jnp.float32, jnp.bfloat16

    # --- activations: flatten spatial onto the lane axis, pad channels -------
    xf = jnp.zeros((B, Cin_p, HWs), bf16).at[:, :Cin].set(
        x.reshape(B, Cin, HWs).astype(bf16))
    brf = jnp.zeros((B, Cb_p, HW), f32).at[:, :Cb].set(
        bridge.reshape(B, Cb, HW).astype(f32))

    # --- ConvTranspose2d weights: (Cin, Cout, 2, 2) -> (4*Cout_p, Cin_p) -----
    upw_p = jnp.zeros((Cin_p, Cout_p, 2, 2), f32).at[:Cin, :Cout].set(
        params['upw'])
    upw_stack = jnp.transpose(upw_p, (2, 3, 1, 0)).reshape(
        4 * Cout_p, Cin_p).astype(bf16)
    upb = jnp.zeros((Cout_p, 1), f32).at[:Cout, 0].set(params['upb'])

    # --- precomputed constants (built once, VMEM-resident across the grid) ---
    # 2x2-stride-2 scatter ("spread") matrices for the transposed conv.
    s = jnp.arange(HWs)
    hs, ws = s // Win, s % Win
    spread = jnp.stack([
        jax.nn.one_hot((2 * hs + ki) * W + (2 * ws + kj), HW, dtype=f32)
        for ki in range(2) for kj in range(2)])                   # (4, HWs, HW)
    # Border masks for the 9 taps of a 3x3 / pad=1 conv applied to rolled slabs.
    q = jnp.arange(HW)
    hq, wq = q // W, q % W
    mask9 = jnp.stack([
        (((hq + dy - 1) >= 0) & ((hq + dy - 1) < H) &
         ((wq + dx - 1) >= 0) & ((wq + dx - 1) < W))
        for dy in range(3) for dx in range(3)]).astype(f32).reshape(9, 1, HW)

    # --- conv1 weights: (Cout, Cb+Cout, 3, 3) -> big-K (Cout_p, 9*Ccat_p) ----
    w1 = params['w1']
    w1b = jnp.zeros((Cout_p, Cb_p, 3, 3), f32).at[:Cout, :Cb].set(w1[:, :Cb])
    w1u = jnp.zeros((Cout_p, Cout_p, 3, 3), f32).at[:Cout, :Cout].set(w1[:, Cb:])
    w1cat = jnp.concatenate([w1b, w1u], axis=1)           # (Cout_p, Ccat_p, 3, 3)
    W1 = jnp.transpose(w1cat, (0, 2, 3, 1)).reshape(
        Cout_p, 9 * Ccat_p).astype(bf16)
    b1 = jnp.zeros((Cout_p, 1), f32).at[:Cout, 0].set(params['b1'])
    g1 = jnp.zeros((Cout_p, HW), f32).at[:Cout].set(params['g1'].reshape(Cout, HW))
    be1 = jnp.zeros((Cout_p, HW), f32).at[:Cout].set(params['be1'].reshape(Cout, HW))

    # --- conv2 weights: (Cout, Cout, 3, 3) -> big-K (Cout_p, 9*Cout_p) -------
    w2p = jnp.zeros((Cout_p, Cout_p, 3, 3), f32).at[:Cout, :Cout].set(params['w2'])
    W2 = jnp.transpose(w2p, (0, 2, 3, 1)).reshape(
        Cout_p, 9 * Cout_p).astype(bf16)
    b2 = jnp.zeros((Cout_p, 1), f32).at[:Cout, 0].set(params['b2'])
    g2 = jnp.zeros((Cout_p, HW), f32).at[:Cout].set(params['g2'].reshape(Cout, HW))
    be2 = jnp.zeros((Cout_p, HW), f32).at[:Cout].set(params['be2'].reshape(Cout, HW))

    def full(a):
        nd = a.ndim
        return pl.BlockSpec(a.shape, lambda b, _nd=nd: (0,) * _nd)

    kernel = functools.partial(_upblock_kernel, H=H, W=W, Cout=Cout,
                               Cout_p=Cout_p, Cb_p=Cb_p)

    out = pl.pallas_call(
        kernel,
        out_shape=jax.ShapeDtypeStruct((B, Cout_p, HW), jnp.float32),
        grid=(B,),
        in_specs=[
            pl.BlockSpec((1, Cin_p, HWs), lambda b: (b, 0, 0)),
            pl.BlockSpec((1, Cb_p, HW), lambda b: (b, 0, 0)),
            full(upw_stack), full(upb), full(spread), full(mask9),
            full(W1), full(b1), full(g1), full(be1),
            full(W2), full(b2), full(g2), full(be2),
        ],
        out_specs=pl.BlockSpec((1, Cout_p, HW), lambda b: (b, 0, 0)),
        scratch_shapes=[
            pltpu.VMEM((Ccat_p, HW), jnp.float32),        # concat([bridge, up])
            pltpu.VMEM((9 * Ccat_p, HW), jnp.bfloat16),   # im2col tap stack
        ],
        compiler_params=pltpu.CompilerParams(
            dimension_semantics=("parallel",),
            vmem_limit_bytes=32 * 1024 * 1024),
    )(xf, brf, upw_stack, upb, spread, mask9,
      W1, b1, g1, be1, W2, b2, g2, be2)

    return out[:, :Cout, :].reshape(B, Cout, H, W)


# ---------------------------------------------------------------------------
# pure-JAX reference (ground truth semantics, plain XLA ops, f32)
# ---------------------------------------------------------------------------
def ref_upblock(x, bridge, p):
    B, Cin, Hin, Win = x.shape
    Cout = p['upw'].shape[1]
    up = jnp.einsum('nchw,cokl->nohkwl', x, p['upw']).reshape(
        B, Cout, 2 * Hin, 2 * Win)
    up = up + p['upb'][None, :, None, None]
    cat = jnp.concatenate([bridge, up], axis=1)

    def conv(v, w, b):
        y = jax.lax.conv_general_dilated(
            v, w, (1, 1), ((1, 1), (1, 1)),
            dimension_numbers=('NCHW', 'OIHW', 'NCHW'))
        return y + b[None, :, None, None]

    def ln(v, g, bta):
        mu = jnp.mean(v, axis=(1, 2, 3), keepdims=True)
        var = jnp.mean((v - mu) ** 2, axis=(1, 2, 3), keepdims=True)
        return (v - mu) * jax.lax.rsqrt(var + 1e-5) * g[None] + bta[None]

    h = jax.nn.relu(ln(conv(cat, p['w1'], p['b1']), p['g1'], p['be1']))
    h = jax.nn.relu(ln(conv(h, p['w2'], p['b2']), p['g2'], p['be2']))
    return h


if __name__ == "__main__":
    key = jax.random.PRNGKey(0)
    B, Cin, Cb, Cout = 2, 8, 6, 4
    Hin = Win = 8          # input spatial (before ConvTranspose2d upsample)
    H = W = 16             # bridge / output spatial (spatial_dims)
    ks = jax.random.split(key, 12)
    params = {
        'upw': 0.2 * jax.random.normal(ks[0], (Cin, Cout, 2, 2), jnp.float32),
        'upb': 0.1 * jax.random.normal(ks[1], (Cout,), jnp.float32),
        'w1': 0.2 * jax.random.normal(ks[2], (Cout, Cb + Cout, 3, 3), jnp.float32),
        'b1': 0.1 * jax.random.normal(ks[3], (Cout,), jnp.float32),
        'g1': 1.0 + 0.1 * jax.random.normal(ks[4], (Cout, H, W), jnp.float32),
        'be1': 0.1 * jax.random.normal(ks[5], (Cout, H, W), jnp.float32),
        'w2': 0.2 * jax.random.normal(ks[6], (Cout, Cout, 3, 3), jnp.float32),
        'b2': 0.1 * jax.random.normal(ks[7], (Cout,), jnp.float32),
        'g2': 1.0 + 0.1 * jax.random.normal(ks[8], (Cout, H, W), jnp.float32),
        'be2': 0.1 * jax.random.normal(ks[9], (Cout, H, W), jnp.float32),
    }
    x = jax.random.normal(ks[10], (B, Cin, Hin, Win), jnp.float32)
    bridge = jax.random.normal(ks[11], (B, Cb, H, W), jnp.float32)

    out = jax.block_until_ready(upblock_forward(x, bridge, params))
    ref = jax.block_until_ready(ref_upblock(x, bridge, params))

    err = float(jnp.max(jnp.abs(out - ref)))
    # Tolerance reflects bf16 MXU operands (f32 accumulation / f32 LayerNorm);
    # the expected max abs error at these sizes is a few 1e-3.
    if out.shape != (B, Cout, H, W) or not (err <= 2e-2):
        raise SystemExit(f"mismatch: shape={out.shape} max_abs_err={err}")
    print("KERNEL_OK")
</pallas_src>

<mosaic_0001>
module attributes {stable_mosaic.version = 11 : i64} {
  func.func @_upblock_kernel(%arg0: i32, %arg1: memref<1x16x64xbf16, #tpu.memory_space<vmem>>, %arg2: memref<1x16x256xf32, #tpu.memory_space<vmem>>, %arg3: memref<64x16xbf16, #tpu.memory_space<vmem>>, %arg4: memref<16x1xf32, #tpu.memory_space<vmem>>, %arg5: memref<4x64x256xf32, #tpu.memory_space<vmem>>, %arg6: memref<9x1x256xf32, #tpu.memory_space<vmem>>, %arg7: memref<16x288xbf16, #tpu.memory_space<vmem>>, %arg8: memref<16x1xf32, #tpu.memory_space<vmem>>, %arg9: memref<16x256xf32, #tpu.memory_space<vmem>>, %arg10: memref<16x256xf32, #tpu.memory_space<vmem>>, %arg11: memref<16x144xbf16, #tpu.memory_space<vmem>>, %arg12: memref<16x1xf32, #tpu.memory_space<vmem>>, %arg13: memref<16x256xf32, #tpu.memory_space<vmem>>, %arg14: memref<16x256xf32, #tpu.memory_space<vmem>>, %arg15: memref<1x16x256xf32, #tpu.memory_space<vmem>>, %arg16: memref<32x256xf32, #tpu.memory_space<vmem>>, %arg17: memref<288x256xbf16, #tpu.memory_space<vmem>>) attributes {dimension_semantics = [#tpu.dimension_semantics<parallel>], iteration_bounds = array<i64: 2>, scalar_prefetch = 0 : i64, scratch_operands = 2 : i64, tpu.core_type = #tpu.core_type<tc>, window_params = [{transform_indices = @transform_0, window_bounds = array<i64: 1, 16, 64>}, {transform_indices = @transform_1, window_bounds = array<i64: 1, 16, 256>}, {pipeline_mode = #tpu.pipeline_mode<synchronous>, transform_indices = @transform_2, window_bounds = array<i64: 64, 16>}, {pipeline_mode = #tpu.pipeline_mode<synchronous>, transform_indices = @transform_3, window_bounds = array<i64: 16, 1>}, {pipeline_mode = #tpu.pipeline_mode<synchronous>, transform_indices = @transform_4, window_bounds = array<i64: 4, 64, 256>}, {pipeline_mode = #tpu.pipeline_mode<synchronous>, transform_indices = @transform_5, window_bounds = array<i64: 9, 1, 256>}, {pipeline_mode = #tpu.pipeline_mode<synchronous>, transform_indices = @transform_6, window_bounds = array<i64: 16, 288>}, {pipeline_mode = #tpu.pipeline_mode<synchronous>, transform_indices = @transform_7, window_bounds = array<i64: 16, 1>}, {pipeline_mode = #tpu.pipeline_mode<synchronous>, transform_indices = @transform_8, window_bounds = array<i64: 16, 256>}, {pipeline_mode = #tpu.pipeline_mode<synchronous>, transform_indices = @transform_9, window_bounds = array<i64: 16, 256>}, {pipeline_mode = #tpu.pipeline_mode<synchronous>, transform_indices = @transform_10, window_bounds = array<i64: 16, 144>}, {pipeline_mode = #tpu.pipeline_mode<synchronous>, transform_indices = @transform_11, window_bounds = array<i64: 16, 1>}, {pipeline_mode = #tpu.pipeline_mode<synchronous>, transform_indices = @transform_12, window_bounds = array<i64: 16, 256>}, {pipeline_mode = #tpu.pipeline_mode<synchronous>, transform_indices = @transform_13, window_bounds = array<i64: 16, 256>}, {transform_indices = @transform_14, window_bounds = array<i64: 1, 16, 256>}]} {
    %c0 = arith.constant 0 : index
    %c0_0 = arith.constant 0 : index
    %c0_1 = arith.constant 0 : index
    %0 = vector.load %arg1[%c0, %c0_0, %c0_1] : memref<1x16x64xbf16, #tpu.memory_space<vmem>>, vector<1x16x64xbf16>
    %1 = vector.shape_cast %0 : vector<1x16x64xbf16> to vector<16x64xbf16>
    %c0_2 = arith.constant 0 : index
    %c0_3 = arith.constant 0 : index
    %2 = vector.load %arg3[%c0_2, %c0_3] : memref<64x16xbf16, #tpu.memory_space<vmem>>, vector<64x16xbf16>
    %cst = arith.constant dense<0.000000e+00> : vector<64x64xf32>
    %3 = tpu.matmul %2, %1, %cst {dimension_numbers = #tpu.dot_dimension_numbers<[1], [0], [0], [1], [0, 0, 1, 1], [], []>} : vector<64x16xbf16>, vector<16x64xbf16>, vector<64x64xf32> -> vector<64x64xf32>
    %cst_4 = arith.constant 0.000000e+00 : f32
    %4 = vector.broadcast %cst_4 : f32 to vector<16x256xf32>
    %5 = vector.extract_strided_slice %3 {offsets = [0, 0], sizes = [16, 64], strides = [1, 1]} : vector<64x64xf32> to vector<16x64xf32>
    %c0_5 = arith.constant 0 : index
    %c0_6 = arith.constant 0 : index
    %c0_7 = arith.constant 0 : index
    %6 = vector.load %arg5[%c0_5, %c0_6, %c0_7] : memref<4x64x256xf32, #tpu.memory_space<vmem>>, vector<1x64x256xf32>
    %7 = vector.shape_cast %6 : vector<1x64x256xf32> to vector<64x256xf32>
    %cst_8 = arith.constant dense<0.000000e+00> : vector<16x256xf32>
    %8 = tpu.matmul %5, %7, %cst_8 {dimension_numbers = #tpu.dot_dimension_numbers<[1], [0], [0], [1], [0, 0, 1, 1], [], []>} : vector<16x64xf32>, vector<64x256xf32>, vector<16x256xf32> -> vector<16x256xf32>
    %9 = arith.addf %4, %8 : vector<16x256xf32>
    %10 = vector.extract_strided_slice %3 {offsets = [16, 0], sizes = [16, 64], strides = [1, 1]} : vector<64x64xf32> to vector<16x64xf32>
    %c1 = arith.constant 1 : index
    %c0_9 = arith.constant 0 : index
    %c0_10 = arith.constant 0 : index
    %11 = vector.load %arg5[%c1, %c0_9, %c0_10] : memref<4x64x256xf32, #tpu.memory_space<vmem>>, vector<1x64x256xf32>
    %12 = vector.shape_cast %11 : vector<1x64x256xf32> to vector<64x256xf32>
    %cst_11 = arith.constant dense<0.000000e+00> : vector<16x256xf32>
    %13 = tpu.matmul %10, %12, %cst_11 {dimension_numbers = #tpu.dot_dimension_numbers<[1], [0], [0], [1], [0, 0, 1, 1], [], []>} : vector<16x64xf32>, vector<64x256xf32>, vector<16x256xf32> -> vector<16x256xf32>
    %14 = arith.addf %9, %13 : vector<16x256xf32>
    %15 = vector.extract_strided_slice %3 {offsets = [32, 0], sizes = [16, 64], strides = [1, 1]} : vector<64x64xf32> to vector<16x64xf32>
    %c2 = arith.constant 2 : index
    %c0_12 = arith.constant 0 : index
    %c0_13 = arith.constant 0 : index
    %16 = vector.load %arg5[%c2, %c0_12, %c0_13] : memref<4x64x256xf32, #tpu.memory_space<vmem>>, vector<1x64x256xf32>
    %17 = vector.shape_cast %16 : vector<1x64x256xf32> to vector<64x256xf32>
    %cst_14 = arith.constant dense<0.000000e+00> : vector<16x256xf32>
    %18 = tpu.matmul %15, %17, %cst_14 {dimension_numbers = #tpu.dot_dimension_numbers<[1], [0], [0], [1], [0, 0, 1, 1], [], []>} : vector<16x64xf32>, vector<64x256xf32>, vector<16x256xf32> -> vector<16x256xf32>
    %19 = arith.addf %14, %18 : vector<16x256xf32>
    %20 = vector.extract_strided_slice %3 {offsets = [48, 0], sizes = [16, 64], strides = [1, 1]} : vector<64x64xf32> to vector<16x64xf32>
    %c3 = arith.constant 3 : index
    %c0_15 = arith.constant 0 : index
    %c0_16 = arith.constant 0 : index
    %21 = vector.load %arg5[%c3, %c0_15, %c0_16] : memref<4x64x256xf32, #tpu.memory_space<vmem>>, vector<1x64x256xf32>
    %22 = vector.shape_cast %21 : vector<1x64x256xf32> to vector<64x256xf32>
    %cst_17 = arith.constant dense<0.000000e+00> : vector<16x256xf32>
    %23 = tpu.matmul %20, %22, %cst_17 {dimension_numbers = #tpu.dot_dimension_numbers<[1], [0], [0], [1], [0, 0, 1, 1], [], []>} : vector<16x64xf32>, vector<64x256xf32>, vector<16x256xf32> -> vector<16x256xf32>
    %24 = arith.addf %19, %23 : vector<16x256xf32>
    %c0_18 = arith.constant 0 : index
    %c0_19 = arith.constant 0 : index
    %25 = vector.load %arg4[%c0_18, %c0_19] : memref<16x1xf32, #tpu.memory_space<vmem>>, vector<16x1xf32>
    %26 = vector.broadcast %25 : vector<16x1xf32> to vector<16x256xf32>
    %27 = arith.addf %24, %26 : vector<16x256xf32>
    %c0_20 = arith.constant 0 : index
    %c0_21 = arith.constant 0 : index
    %c0_22 = arith.constant 0 : index
    %28 = vector.load %arg2[%c0_20, %c0_21, %c0_22] : memref<1x16x256xf32, #tpu.memory_space<vmem>>, vector<1x16x256xf32>
    %29 = vector.shape_cast %28 : vector<1x16x256xf32> to vector<16x256xf32>
    %c0_23 = arith.constant 0 : index
    %c0_24 = arith.constant 0 : index
    %30 = vector.load %arg16[%c0_23, %c0_24] : memref<32x256xf32, #tpu.memory_space<vmem>>, vector<16x256xf32>
    tpu.vector_store %arg16[%c0_23, %c0_24], %29 {strides = array<i32>} : memref<32x256xf32, #tpu.memory_space<vmem>>, vector<16x256xf32>,
    %c16 = arith.constant 16 : index
    %c0_25 = arith.constant 0 : index
    %31 = vector.load %arg16[%c16, %c0_25] : memref<32x256xf32, #tpu.memory_space<vmem>>, vector<16x256xf32>
    tpu.vector_store %arg16[%c16, %c0_25], %27 {strides = array<i32>} : memref<32x256xf32, #tpu.memory_space<vmem>>, vector<16x256xf32>,
    %32 = tpu.iota {dimensions = array<i32: 0>} : vector<16x1xi32>
    %c4_i32 = arith.constant 4 : i32
    %33 = vector.broadcast %c4_i32 : i32 to vector<16x1xi32>
    %34 = arith.cmpi slt, %32, %33 : vector<16x1xi32>
    %35 = arith.extui %34 : vector<16x1xi1> to vector<16x1xi32>
    %36 = arith.sitofp %35 : vector<16x1xi32> to vector<16x1xf32>
    %c0_26 = arith.constant 0 : index
    %c0_27 = arith.constant 0 : index
    %37 = vector.load %arg16[%c0_26, %c0_27] : memref<32x256xf32, #tpu.memory_space<vmem>>, vector<32x256xf32>
    %c17_i32 = arith.constant 17 : i32
    %38 = tpu.dynamic_rotate %37 by %c17_i32 dim 1 : vector<32x256xf32>, i32 -> vector<32x256xf32>
    %c0_28 = arith.constant 0 : index
    %c0_29 = arith.constant 0 : index
    %c0_30 = arith.constant 0 : index
    %39 = vector.load %arg6[%c0_28, %c0_29, %c0_30] : memref<9x1x256xf32, #tpu.memory_space<vmem>>, vector<1x1x256xf32>
    %40 = vector.shape_cast %39 : vector<1x1x256xf32> to vector<1x256xf32>
    %41 = vector.broadcast %40 : vector<1x256xf32> to vector<32x256xf32>
    %42 = arith.mulf %38, %41 : vector<32x256xf32>
    %43 = arith.truncf %42 : vector<32x256xf32> to vector<32x256xbf16>
    %c0_31 = arith.constant 0 : index
    %c0_32 = arith.constant 0 : index
    %44 = vector.load %arg17[%c0_31, %c0_32] : memref<288x256xbf16, #tpu.memory_space<vmem>>, vector<32x256xbf16>
    tpu.vector_store %arg17[%c0_31, %c0_32], %43 {strides = array<i32>} : memref<288x256xbf16, #tpu.memory_space<vmem>>, vector<32x256xbf16>,
    %c16_i32 = arith.constant 16 : i32
    %45 = tpu.dynamic_rotate %37 by %c16_i32 dim 1 : vector<32x256xf32>, i32 -> vector<32x256xf32>
    %c1_33 = arith.constant 1 : index
    %c0_34 = arith.constant 0 : index
    %c0_35 = arith.constant 0 : index
    %46 = vector.load %arg6[%c1_33, %c0_34, %c0_35] : memref<9x1x256xf32, #tpu.memory_space<vmem>>, vector<1x1x256xf32>
    %47 = vector.shape_cast %46 : vector<1x1x256xf32> to vector<1x256xf32>
    %48 = vector.broadcast %47 : vector<1x256xf32> to vector<32x256xf32>
    %49 = arith.mulf %45, %48 : vector<32x256xf32>
    %50 = arith.truncf %49 : vector<32x256xf32> to vector<32x256xbf16>
    %c32 = arith.constant 32 : index
    %c0_36 = arith.constant 0 : index
    %51 = vector.load %arg17[%c32, %c0_36] : memref<288x256xbf16, #tpu.memory_space<vmem>>, vector<32x256xbf16>
    tpu.vector_store %arg17[%c32, %c0_36], %50 {strides = array<i32>} : memref<288x256xbf16, #tpu.memory_space<vmem>>, vector<32x256xbf16>,
    %c15_i32 = arith.constant 15 : i32
    %52 = tpu.dynamic_rotate %37 by %c15_i32 dim 1 : vector<32x256xf32>, i32 -> vector<32x256xf32>
    %c2_37 = arith.constant 2 : index
    %c0_38 = arith.constant 0 : index
    %c0_39 = arith.constant 0 : index
    %53 = vector.load %arg6[%c2_37, %c0_38, %c0_39] : memref<9x1x256xf32, #tpu.memory_space<vmem>>, vector<1x1x256xf32>
    %54 = vector.shape_cast %53 : vector<1x1x256xf32> to vector<1x256xf32>
    %55 = vector.broadcast %54 : vector<1x256xf32> to vector<32x256xf32>
    %56 = arith.mulf %52, %55 : vector<32x256xf32>
    %57 = arith.truncf %56 : vector<32x256xf32> to vector<32x256xbf16>
    %c64 = arith.constant 64 : index
    %c0_40 = arith.constant 0 : index
    %58 = vector.load %arg17[%c64, %c0_40] : memref<288x256xbf16, #tpu.memory_space<vmem>>, vector<32x256xbf16>
    tpu.vector_store %arg17[%c64, %c0_40], %57 {strides = array<i32>} : memref<288x256xbf16, #tpu.memory_space<vmem>>, vector<32x256xbf16>,
    %c1_i32 = arith.constant 1 : i32
    %59 = tpu.dynamic_rotate %37 by %c1_i32 dim 1 : vector<32x256xf32>, i32 -> vector<32x256xf32>
    %c3_41 = arith.constant 3 : index
    %c0_42 = arith.constant 0 : index
    %c0_43 = arith.constant 0 : index
    %60 = vector.load %arg6[%c3_41, %c0_42, %c0_43] : memref<9x1x256xf32, #tpu.memory_space<vmem>>, vector<1x1x256xf32>
    %61 = vector.shape_cast %60 : vector<1x1x256xf32> to vector<1x256xf32>
    %62 = vector.broadcast %61 : vector<1x256xf32> to vector<32x256xf32>
    %63 = arith.mulf %59, %62 : vector<32x256xf32>
    %64 = arith.truncf %63 : vector<32x256xf32> to vector<32x256xbf16>
    %c96 = arith.constant 96 : index
    %c0_44 = arith.constant 0 : index
    %65 = vector.load %arg17[%c96, %c0_44] : memref<288x256xbf16, #tpu.memory_space<vmem>>, vector<32x256xbf16>
    tpu.vector_store %arg17[%c96, %c0_44], %64 {strides = array<i32>} : memref<288x256xbf16, #tpu.memory_space<vmem>>, vector<32x256xbf16>,
    %66 = arith.truncf %37 : vector<32x256xf32> to vector<32x256xbf16>
    %c128 = arith.constant 128 : index
    %c0_45 = arith.constant 0 : index
    %67 = vector.load %arg17[%c128, %c0_45] : memref<288x256xbf16, #tpu.memory_space<vmem>>, vector<32x256xbf16>
    tpu.vector_store %arg17[%c128, %c0_45], %66 {strides = array<i32>} : memref<288x256xbf16, #tpu.memory_space<vmem>>, vector<32x256xbf16>,
    %c255_i32 = arith.constant 255 : i32
    %68 = tpu.dynamic_rotate %37 by %c255_i32 dim 1 : vector<32x256xf32>, i32 -> vector<32x256xf32>
    %c5 = arith.constant 5 : index
    %c0_46 = arith.constant 0 : index
    %c0_47 = arith.constant 0 : index
    %69 = vector.load %arg6[%c5, %c0_46, %c0_47] : memref<9x1x256xf32, #tpu.memory_space<vmem>>, vector<1x1x256xf32>
    %70 = vector.shape_cast %69 : vector<1x1x256xf32> to vector<1x256xf32>
    %71 = vector.broadcast %70 : vector<1x256xf32> to vector<32x256xf32>
    %72 = arith.mulf %68, %71 : vector<32x256xf32>
    %73 = arith.truncf %72 : vector<32x256xf32> to vector<32x256xbf16>
    %c160 = arith.constant 160 : index
    %c0_48 = arith.constant 0 : index
    %74 = vector.load %arg17[%c160, %c0_48] : memref<288x256xbf16, #tpu.memory_space<vmem>>, vector<32x256xbf16>
    tpu.vector_store %arg17[%c160, %c0_48], %73 {strides = array<i32>} : memref<288x256xbf16, #tpu.memory_space<vmem>>, vector<32x256xbf16>,
    %c241_i32 = arith.constant 241 : i32
    %75 = tpu.dynamic_rotate %37 by %c241_i32 dim 1 : vector<32x256xf32>, i32 -> vector<32x256xf32>
    %c6 = arith.constant 6 : index
    %c0_49 = arith.constant 0 : index
    %c0_50 = arith.constant 0 : index
    %76 = vector.load %arg6[%c6, %c0_49, %c0_50] : memref<9x1x256xf32, #tpu.memory_space<vmem>>, vector<1x1x256xf32>
    %77 = vector.shape_cast %76 : vector<1x1x256xf32> to vector<1x256xf32>
    %78 = vector.broadcast %77 : vector<1x256xf32> to vector<32x256xf32>
    %79 = arith.mulf %75, %78 : vector<32x256xf32>
    %80 = arith.truncf %79 : vector<32x256xf32> to vector<32x256xbf16>
    %c192 = arith.constant 192 : index
    %c0_51 = arith.constant 0 : index
    %81 = vector.load %arg17[%c192, %c0_51] : memref<288x256xbf16, #tpu.memory_space<vmem>>, vector<32x256xbf16>
    tpu.vector_store %arg17[%c192, %c0_51], %80 {strides = array<i32>} : memref<288x256xbf16, #tpu.memory_space<vmem>>, vector<32x256xbf16>,
    %c240_i32 = arith.constant 240 : i32
    %82 = tpu.dynamic_rotate %37 by %c240_i32 dim 1 : vector<32x256xf32>, i32 -> vector<32x256xf32>
    %c7 = arith.constant 7 : index
    %c0_52 = arith.constant 0 : index
    %c0_53 = arith.constant 0 : index
    %83 = vector.load %arg6[%c7, %c0_52, %c0_53] : memref<9x1x256xf32, #tpu.memory_space<vmem>>, vector<1x1x256xf32>
    %84 = vector.shape_cast %83 : vector<1x1x256xf32> to vector<1x256xf32>
    %85 = vector.broadcast %84 : vector<1x256xf32> to vector<32x256xf32>
    %86 = arith.mulf %82, %85 : vector<32x256xf32>
    %87 = arith.truncf %86 : vector<32x256xf32> to vector<32x256xbf16>
    %c224 = arith.constant 224 : index
    %c0_54 = arith.constant 0 : index
    %88 = vector.load %arg17[%c224, %c0_54] : memref<288x256xbf16, #tpu.memory_space<vmem>>, vector<32x256xbf16>
    tpu.vector_store %arg17[%c224, %c0_54], %87 {strides = array<i32>} : memref<288x256xbf16, #tpu.memory_space<vmem>>, vector<32x256xbf16>,
    %c239_i32 = arith.constant 239 : i32
    %89 = tpu.dynamic_rotate %37 by %c239_i32 dim 1 : vector<32x256xf32>, i32 -> vector<32x256xf32>
    %c8 = arith.constant 8 : index
    %c0_55 = arith.constant 0 : index
    %c0_56 = arith.constant 0 : index
    %90 = vector.load %arg6[%c8, %c0_55, %c0_56] : memref<9x1x256xf32, #tpu.memory_space<vmem>>, vector<1x1x256xf32>
    %91 = vector.shape_cast %90 : vector<1x1x256xf32> to vector<1x256xf32>
    %92 = vector.broadcast %91 : vector<1x256xf32> to vector<32x256xf32>
    %93 = arith.mulf %89, %92 : vector<32x256xf32>
    %94 = arith.truncf %93 : vector<32x256xf32> to vector<32x256xbf16>
    %c256 = arith.constant 256 : index
    %c0_57 = arith.constant 0 : index
    %95 = vector.load %arg17[%c256, %c0_57] : memref<288x256xbf16, #tpu.memory_space<vmem>>, vector<32x256xbf16>
    tpu.vector_store %arg17[%c256, %c0_57], %94 {strides = array<i32>} : memref<288x256xbf16, #tpu.memory_space<vmem>>, vector<32x256xbf16>,
    %c0_58 = arith.constant 0 : index
    %c0_59 = arith.constant 0 : index
    %96 = vector.load %arg7[%c0_58, %c0_59] : memref<16x288xbf16, #tpu.memory_space<vmem>>, vector<16x288xbf16>
    %c0_60 = arith.constant 0 : index
    %c0_61 = arith.constant 0 : index
    %97 = vector.load %arg17[%c0_60, %c0_61] : memref<288x256xbf16, #tpu.memory_space<vmem>>, vector<288x256xbf16>
    %cst_62 = arith.constant dense<0.000000e+00> : vector<16x256xf32>
    %98 = tpu.matmul %96, %97, %cst_62 {dimension_numbers = #tpu.dot_dimension_numbers<[1], [0], [0], [1], [0, 0, 1, 1], [], []>} : vector<16x288xbf16>, vector<288x256xbf16>, vector<16x256xf32> -> vector<16x256xf32>
    %c0_63 = arith.constant 0 : index
    %c0_64 = arith.constant 0 : index
    %99 = vector.load %arg8[%c0_63, %c0_64] : memref<16x1xf32, #tpu.memory_space<vmem>>, vector<16x1xf32>
    %100 = vector.broadcast %99 : vector<16x1xf32> to vector<16x256xf32>
    %101 = arith.addf %98, %100 : vector<16x256xf32>
    %c0_65 = arith.constant 0 : index
    %c0_66 = arith.constant 0 : index
    %102 = vector.load %arg9[%c0_65, %c0_66] : memref<16x256xf32, #tpu.memory_space<vmem>>, vector<16x256xf32>
    %c0_67 = arith.constant 0 : index
    %c0_68 = arith.constant 0 : index
    %103 = vector.load %arg10[%c0_67, %c0_68] : memref<16x256xf32, #tpu.memory_space<vmem>>, vector<16x256xf32>
    %104 = vector.broadcast %36 : vector<16x1xf32> to vector<16x256xf32>
    %105 = arith.mulf %101, %104 : vector<16x256xf32>
    %106 = vector.shape_cast %105 : vector<16x256xf32> to vector<1x16x256xf32>
    %cst_69 = arith.constant dense<0.000000e+00> : vector<1xf32>
    %107 = vector.multi_reduction <add>, %106, %cst_69 [1, 2] : vector<1x16x256xf32> to vector<1xf32>
    %108 = vector.shape_cast %107 : vector<1xf32> to vector<1x1x1xf32>
    %109 = vector.extract %108[0, 0, 0] : f32 from vector<1x1x1xf32>
    %110 = vector.broadcast %109 : f32 to vector<1x1xf32>
    %cst_70 = arith.constant 9.765625E-4 : f32
    %111 = vector.broadcast %cst_70 : f32 to vector<1x1xf32>
    %112 = arith.mulf %110, %111 : vector<1x1xf32>
    %113 = vector.broadcast %112 : vector<1x1xf32> to vector<16x256xf32>
    %114 = arith.subf %101, %113 : vector<16x256xf32>
    %115 = vector.broadcast %36 : vector<16x1xf32> to vector<16x256xf32>
    %116 = arith.mulf %114, %115 : vector<16x256xf32>
    %117 = arith.mulf %116, %116 : vector<16x256xf32>
    %118 = vector.shape_cast %117 : vector<16x256xf32> to vector<1x16x256xf32>
    %cst_71 = arith.constant dense<0.000000e+00> : vector<1xf32>
    %119 = vector.multi_reduction <add>, %118, %cst_71 [1, 2] : vector<1x16x256xf32> to vector<1xf32>
    %120 = vector.shape_cast %119 : vector<1xf32> to vector<1x1x1xf32>
    %121 = vector.extract %120[0, 0, 0] : f32 from vector<1x1x1xf32>
    %122 = vector.broadcast %121 : f32 to vector<1x1xf32>
    %cst_72 = arith.constant 9.765625E-4 : f32
    %123 = vector.broadcast %cst_72 : f32 to vector<1x1xf32>
    %124 = arith.mulf %122, %123 : vector<1x1xf32>
    %125 = vector.broadcast %112 : vector<1x1xf32> to vector<16x256xf32>
    %126 = arith.subf %101, %125 : vector<16x256xf32>
    %cst_73 = arith.constant 9.99999974E-6 : f32
    %127 = vector.broadcast %cst_73 : f32 to vector<1x1xf32>
    %128 = arith.addf %124, %127 : vector<1x1xf32>
    %129 = math.rsqrt %128 : vector<1x1xf32>
    %130 = vector.broadcast %129 : vector<1x1xf32> to vector<16x256xf32>
    %131 = arith.mulf %126, %130 : vector<16x256xf32>
    %132 = arith.mulf %131, %102 : vector<16x256xf32>
    %133 = arith.addf %132, %103 : vector<16x256xf32>
    %cst_74 = arith.constant 0.000000e+00 : f32
    %134 = vector.broadcast %cst_74 : f32 to vector<16x256xf32>
    %135 = arith.maximumf %133, %134 : vector<16x256xf32>
    %c17_i32_75 = arith.constant 17 : i32
    %136 = tpu.dynamic_rotate %135 by %c17_i32_75 dim 1 : vector<16x256xf32>, i32 -> vector<16x256xf32>
    %c0_76 = arith.constant 0 : index
    %c0_77 = arith.constant 0 : index
    %c0_78 = arith.constant 0 : index
    %137 = vector.load %arg6[%c0_76, %c0_77, %c0_78] : memref<9x1x256xf32, #tpu.memory_space<vmem>>, vector<1x1x256xf32>
    %138 = vector.shape_cast %137 : vector<1x1x256xf32> to vector<1x256xf32>
    %139 = vector.broadcast %138 : vector<1x256xf32> to vector<16x256xf32>
    %140 = arith.mulf %136, %139 : vector<16x256xf32>
    %141 = arith.truncf %140 : vector<16x256xf32> to vector<16x256xbf16>
    %c0_79 = arith.constant 0 : index
    %c0_80 = arith.constant 0 : index
    %142 = vector.load %arg17[%c0_79, %c0_80] : memref<288x256xbf16, #tpu.memory_space<vmem>>, vector<16x256xbf16>
    tpu.vector_store %arg17[%c0_79, %c0_80], %141 {strides = array<i32>} : memref<288x256xbf16, #tpu.memory_space<vmem>>, vector<16x256xbf16>,
    %c16_i32_81 = arith.constant 16 : i32
    %143 = tpu.dynamic_rotate %135 by %c16_i32_81 dim 1 : vector<16x256xf32>, i32 -> vector<16x256xf32>
    %c1_82 = arith.constant 1 : index
    %c0_83 = arith.constant 0 : index
    %c0_84 = arith.constant 0 : index
    %144 = vector.load %arg6[%c1_82, %c0_83, %c0_84] : memref<9x1x256xf32, #tpu.memory_space<vmem>>, vector<1x1x256xf32>
    %145 = vector.shape_cast %144 : vector<1x1x256xf32> to vector<1x256xf32>
    %146 = vector.broadcast %145 : vector<1x256xf32> to vector<16x256xf32>
    %147 = arith.mulf %143, %146 : vector<16x256xf32>
    %148 = arith.truncf %147 : vector<16x256xf32> to vector<16x256xbf16>
    %c16_85 = arith.constant 16 : index
    %c0_86 = arith.constant 0 : index
    %149 = vector.load %arg17[%c16_85, %c0_86] : memref<288x256xbf16, #tpu.memory_space<vmem>>, vector<16x256xbf16>
    tpu.vector_store %arg17[%c16_85, %c0_86], %148 {strides = array<i32>} : memref<288x256xbf16, #tpu.memory_space<vmem>>, vector<16x256xbf16>,
    %c15_i32_87 = arith.constant 15 : i32
    %150 = tpu.dynamic_rotate %135 by %c15_i32_87 dim 1 : vector<16x256xf32>, i32 -> vector<16x256xf32>
    %c2_88 = arith.constant 2 : index
    %c0_89 = arith.constant 0 : index
    %c0_90 = arith.constant 0 : index
    %151 = vector.load %arg6[%c2_88, %c0_89, %c0_90] : memref<9x1x256xf32, #tpu.memory_space<vmem>>, vector<1x1x256xf32>
    %152 = vector.shape_cast %151 : vector<1x1x256xf32> to vector<1x256xf32>
    %153 = vector.broadcast %152 : vector<1x256xf32> to vector<16x256xf32>
    %154 = arith.mulf %150, %153 : vector<16x256xf32>
    %155 = arith.truncf %154 : vector<16x256xf32> to vector<16x256xbf16>
    %c32_91 = arith.constant 32 : index
    %c0_92 = arith.constant 0 : index
    %156 = vector.load %arg17[%c32_91, %c0_92] : memref<288x256xbf16, #tpu.memory_space<vmem>>, vector<16x256xbf16>
    tpu.vector_store %arg17[%c32_91, %c0_92], %155 {strides = array<i32>} : memref<288x256xbf16, #tpu.memory_space<vmem>>, vector<16x256xbf16>,
    %c1_i32_93 = arith.constant 1 : i32
    %157 = tpu.dynamic_rotate %135 by %c1_i32_93 dim 1 : vector<16x256xf32>, i32 -> vector<16x256xf32>
    %c3_94 = arith.constant 3 : index
    %c0_95 = arith.constant 0 : index
    %c0_96 = arith.constant 0 : index
    %158 = vector.load %arg6[%c3_94, %c0_95, %c0_96] : memref<9x1x256xf32, #tpu.memory_space<vmem>>, vector<1x1x256xf32>
    %159 = vector.shape_cast %158 : vector<1x1x256xf32> to vector<1x256xf32>
    %160 = vector.broadcast %159 : vector<1x256xf32> to vector<16x256xf32>
    %161 = arith.mulf %157, %160 : vector<16x256xf32>
    %162 = arith.truncf %161 : vector<16x256xf32> to vector<16x256xbf16>
    %c48 = arith.constant 48 : index
    %c0_97 = arith.constant 0 : index
    %163 = vector.load %arg17[%c48, %c0_97] : memref<288x256xbf16, #tpu.memory_space<vmem>>, vector<16x256xbf16>
    tpu.vector_store %arg17[%c48, %c0_97], %162 {strides = array<i32>} : memref<288x256xbf16, #tpu.memory_space<vmem>>, vector<16x256xbf16>,
    %164 = arith.truncf %135 : vector<16x256xf32> to vector<16x256xbf16>
    %c64_98 = arith.constant 64 : index
    %c0_99 = arith.constant 0 : index
    %165 = vector.load %arg17[%c64_98, %c0_99] : memref<288x256xbf16, #tpu.memory_space<vmem>>, vector<16x256xbf16>
    tpu.vector_store %arg17[%c64_98, %c0_99], %164 {strides = array<i32>} : memref<288x256xbf16, #tpu.memory_space<vmem>>, vector<16x256xbf16>,
    %c255_i32_100 = arith.constant 255 : i32
    %166 = tpu.dynamic_rotate %135 by %c255_i32_100 dim 1 : vector<16x256xf32>, i32 -> vector<16x256xf32>
    %c5_101 = arith.constant 5 : index
    %c0_102 = arith.constant 0 : index
    %c0_103 = arith.constant 0 : index
    %167 = vector.load %arg6[%c5_101, %c0_102, %c0_103] : memref<9x1x256xf32, #tpu.memory_space<vmem>>, vector<1x1x256xf32>
    %168 = vector.shape_cast %167 : vector<1x1x256xf32> to vector<1x256xf32>
    %169 = vector.broadcast %168 : vector<1x256xf32> to vector<16x256xf32>
    %170 = arith.mulf %166, %169 : vector<16x256xf32>
    %171 = arith.truncf %170 : vector<16x256xf32> to vector<16x256xbf16>
    %c80 = arith.constant 80 : index
    %c0_104 = arith.constant 0 : index
    %172 = vector.load %arg17[%c80, %c0_104] : memref<288x256xbf16, #tpu.memory_space<vmem>>, vector<16x256xbf16>
    tpu.vector_store %arg17[%c80, %c0_104], %171 {strides = array<i32>} : memref<288x256xbf16, #tpu.memory_space<vmem>>, vector<16x256xbf16>,
    %c241_i32_105 = arith.constant 241 : i32
    %173 = tpu.dynamic_rotate %135 by %c241_i32_105 dim 1 : vector<16x256xf32>, i32 -> vector<16x256xf32>
    %c6_106 = arith.constant 6 : index
    %c0_107 = arith.constant 0 : index
    %c0_108 = arith.constant 0 : index
    %174 = vector.load %arg6[%c6_106, %c0_107, %c0_108] : memref<9x1x256xf32, #tpu.memory_space<vmem>>, vector<1x1x256xf32>
    %175 = vector.shape_cast %174 : vector<1x1x256xf32> to vector<1x256xf32>
    %176 = vector.broadcast %175 : vector<1x256xf32> to vector<16x256xf32>
    %177 = arith.mulf %173, %176 : vector<16x256xf32>
    %178 = arith.truncf %177 : vector<16x256xf32> to vector<16x256xbf16>
    %c96_109 = arith.constant 96 : index
    %c0_110 = arith.constant 0 : index
    %179 = vector.load %arg17[%c96_109, %c0_110] : memref<288x256xbf16, #tpu.memory_space<vmem>>, vector<16x256xbf16>
    tpu.vector_store %arg17[%c96_109, %c0_110], %178 {strides = array<i32>} : memref<288x256xbf16, #tpu.memory_space<vmem>>, vector<16x256xbf16>,
    %c240_i32_111 = arith.constant 240 : i32
    %180 = tpu.dynamic_rotate %135 by %c240_i32_111 dim 1 : vector<16x256xf32>, i32 -> vector<16x256xf32>
    %c7_112 = arith.constant 7 : index
    %c0_113 = arith.constant 0 : index
    %c0_114 = arith.constant 0 : index
    %181 = vector.load %arg6[%c7_112, %c0_113, %c0_114] : memref<9x1x256xf32, #tpu.memory_space<vmem>>, vector<1x1x256xf32>
    %182 = vector.shape_cast %181 : vector<1x1x256xf32> to vector<1x256xf32>
    %183 = vector.broadcast %182 : vector<1x256xf32> to vector<16x256xf32>
    %184 = arith.mulf %180, %183 : vector<16x256xf32>
    %185 = arith.truncf %184 : vector<16x256xf32> to vector<16x256xbf16>
    %c112 = arith.constant 112 : index
    %c0_115 = arith.constant 0 : index
    %186 = vector.load %arg17[%c112, %c0_115] : memref<288x256xbf16, #tpu.memory_space<vmem>>, vector<16x256xbf16>
    tpu.vector_store %arg17[%c112, %c0_115], %185 {strides = array<i32>} : memref<288x256xbf16, #tpu.memory_space<vmem>>, vector<16x256xbf16>,
    %c239_i32_116 = arith.constant 239 : i32
    %187 = tpu.dynamic_rotate %135 by %c239_i32_116 dim 1 : vector<16x256xf32>, i32 -> vector<16x256xf32>
    %c8_117 = arith.constant 8 : index
    %c0_118 = arith.constant 0 : index
    %c0_119 = arith.constant 0 : index
    %188 = vector.load %arg6[%c8_117, %c0_118, %c0_119] : memref<9x1x256xf32, #tpu.memory_space<vmem>>, vector<1x1x256xf32>
    %189 = vector.shape_cast %188 : vector<1x1x256xf32> to vector<1x256xf32>
    %190 = vector.broadcast %189 : vector<1x256xf32> to vector<16x256xf32>
    %191 = arith.mulf %187, %190 : vector<16x256xf32>
    %192 = arith.truncf %191 : vector<16x256xf32> to vector<16x256xbf16>
    %c128_120 = arith.constant 128 : index
    %c0_121 = arith.constant 0 : index
    %193 = vector.load %arg17[%c128_120, %c0_121] : memref<288x256xbf16, #tpu.memory_space<vmem>>, vector<16x256xbf16>
    tpu.vector_store %arg17[%c128_120, %c0_121], %192 {strides = array<i32>} : memref<288x256xbf16, #tpu.memory_space<vmem>>, vector<16x256xbf16>,
    %c0_122 = arith.constant 0 : index
    %c0_123 = arith.constant 0 : index
    %194 = vector.load %arg11[%c0_122, %c0_123] : memref<16x144xbf16, #tpu.memory_space<vmem>>, vector<16x144xbf16>
    %c0_124 = arith.constant 0 : index
    %c0_125 = arith.constant 0 : index
    %195 = vector.load %arg17[%c0_124, %c0_125] : memref<288x256xbf16, #tpu.memory_space<vmem>>, vector<144x256xbf16>
    %cst_126 = arith.constant dense<0.000000e+00> : vector<16x256xf32>
    %196 = tpu.matmul %194, %195, %cst_126 {dimension_numbers = #tpu.dot_dimension_numbers<[1], [0], [0], [1], [0, 0, 1, 1], [], []>} : vector<16x144xbf16>, vector<144x256xbf16>, vector<16x256xf32> -> vector<16x256xf32>
    %c0_127 = arith.constant 0 : index
    %c0_128 = arith.constant 0 : index
    %197 = vector.load %arg12[%c0_127, %c0_128] : memref<16x1xf32, #tpu.memory_space<vmem>>, vector<16x1xf32>
    %198 = vector.broadcast %197 : vector<16x1xf32> to vector<16x256xf32>
    %199 = arith.addf %196, %198 : vector<16x256xf32>
    %c0_129 = arith.constant 0 : index
    %c0_130 = arith.constant 0 : index
    %200 = vector.load %arg13[%c0_129, %c0_130] : memref<16x256xf32, #tpu.memory_space<vmem>>, vector<16x256xf32>
    %c0_131 = arith.constant 0 : index
    %c0_132 = arith.constant 0 : index
    %201 = vector.load %arg14[%c0_131, %c0_132] : memref<16x256xf32, #tpu.memory_space<vmem>>, vector<16x256xf32>
    %202 = vector.broadcast %36 : vector<16x1xf32> to vector<16x256xf32>
    %203 = arith.mulf %199, %202 : vector<16x256xf32>
    %204 = vector.shape_cast %203 : vector<16x256xf32> to vector<1x16x256xf32>
    %cst_133 = arith.constant dense<0.000000e+00> : vector<1xf32>
    %205 = vector.multi_reduction <add>, %204, %cst_133 [1, 2] : vector<1x16x256xf32> to vector<1xf32>
    %206 = vector.shape_cast %205 : vector<1xf32> to vector<1x1x1xf32>
    %207 = vector.extract %206[0, 0, 0] : f32 from vector<1x1x1xf32>
    %208 = vector.broadcast %207 : f32 to vector<1x1xf32>
    %cst_134 = arith.constant 9.765625E-4 : f32
    %209 = vector.broadcast %cst_134 : f32 to vector<1x1xf32>
    %210 = arith.mulf %208, %209 : vector<1x1xf32>
    %211 = vector.broadcast %210 : vector<1x1xf32> to vector<16x256xf32>
    %212 = arith.subf %199, %211 : vector<16x256xf32>
    %213 = vector.broadcast %36 : vector<16x1xf32> to vector<16x256xf32>
    %214 = arith.mulf %212, %213 : vector<16x256xf32>
    %215 = arith.mulf %214, %214 : vector<16x256xf32>
    %216 = vector.shape_cast %215 : vector<16x256xf32> to vector<1x16x256xf32>
    %cst_135 = arith.constant dense<0.000000e+00> : vector<1xf32>
    %217 = vector.multi_reduction <add>, %216, %cst_135 [1, 2] : vector<1x16x256xf32> to vector<1xf32>
    %218 = vector.shape_cast %217 : vector<1xf32> to vector<1x1x1xf32>
    %219 = vector.extract %218[0, 0, 0] : f32 from vector<1x1x1xf32>
    %220 = vector.broadcast %219 : f32 to vector<1x1xf32>
    %cst_136 = arith.constant 9.765625E-4 : f32
    %221 = vector.broadcast %cst_136 : f32 to vector<1x1xf32>
    %222 = arith.mulf %220, %221 : vector<1x1xf32>
    %223 = vector.broadcast %210 : vector<1x1xf32> to vector<16x256xf32>
    %224 = arith.subf %199, %223 : vector<16x256xf32>
    %cst_137 = arith.constant 9.99999974E-6 : f32
    %225 = vector.broadcast %cst_137 : f32 to vector<1x1xf32>
    %226 = arith.addf %222, %225 : vector<1x1xf32>
    %227 = math.rsqrt %226 : vector<1x1xf32>
    %228 = vector.broadcast %227 : vector<1x1xf32> to vector<16x256xf32>
    %229 = arith.mulf %224, %228 : vector<16x256xf32>
    %230 = arith.mulf %229, %200 : vector<16x256xf32>
    %231 = arith.addf %230, %201 : vector<16x256xf32>
    %cst_138 = arith.constant 0.000000e+00 : f32
    %232 = vector.broadcast %cst_138 : f32 to vector<16x256xf32>
    %233 = arith.maximumf %231, %232 : vector<16x256xf32>
    %c0_139 = arith.constant 0 : index
    %c0_140 = arith.constant 0 : index
    %c0_141 = arith.constant 0 : index
    %234 = vector.load %arg15[%c0_139, %c0_140, %c0_141] : memref<1x16x256xf32, #tpu.memory_space<vmem>>, vector<1x16x256xf32>
    %235 = vector.shape_cast %234 : vector<1x16x256xf32> to vector<16x256xf32>
    %236 = vector.shape_cast %233 : vector<16x256xf32> to vector<1x16x256xf32>
    tpu.vector_store %arg15[%c0_139, %c0_140, %c0_141], %236 {strides = array<i32>} : memref<1x16x256xf32, #tpu.memory_space<vmem>>, vector<1x16x256xf32>,
    return
  }
  func.func @transform_0(%arg0: i32) -> (i32, i32, i32) {
    %c0_i32 = arith.constant 0 : i32
    %c0_i32_0 = arith.constant 0 : i32
    %c0_i32_1 = arith.constant 0 : i32
    return %arg0, %c0_i32, %c0_i32_0 : i32, i32, i32
  }
  func.func @transform_1(%arg0: i32) -> (i32, i32, i32) {
    %c0_i32 = arith.constant 0 : i32
    %c0_i32_0 = arith.constant 0 : i32
    %c0_i32_1 = arith.constant 0 : i32
    return %arg0, %c0_i32, %c0_i32_0 : i32, i32, i32
  }
  func.func @transform_2(%arg0: i32) -> (i32, i32) {
    %c0_i32 = arith.constant 0 : i32
    %c0_i32_0 = arith.constant 0 : i32
    %c0_i32_1 = arith.constant 0 : i32
    return %c0_i32, %c0_i32_0 : i32, i32
  }
  func.func @transform_3(%arg0: i32) -> (i32, i32) {
    %c0_i32 = arith.constant 0 : i32
    %c0_i32_0 = arith.constant 0 : i32
    %c0_i32_1 = arith.constant 0 : i32
    return %c0_i32, %c0_i32_0 : i32, i32
  }
  func.func @transform_4(%arg0: i32) -> (i32, i32, i32) {
    %c0_i32 = arith.constant 0 : i32
    %c0_i32_0 = arith.constant 0 : i32
    %c0_i32_1 = arith.constant 0 : i32
    %c0_i32_2 = arith.constant 0 : i32
    return %c0_i32, %c0_i32_0, %c0_i32_1 : i32, i32, i32
  }
  func.func @transform_5(%arg0: i32) -> (i32, i32, i32) {
    %c0_i32 = arith.constant 0 : i32
    %c0_i32_0 = arith.constant 0 : i32
    %c0_i32_1 = arith.constant 0 : i32
    %c0_i32_2 = arith.constant 0 : i32
    return %c0_i32, %c0_i32_0, %c0_i32_1 : i32, i32, i32
  }
  func.func @transform_6(%arg0: i32) -> (i32, i32) {
    %c0_i32 = arith.constant 0 : i32
    %c0_i32_0 = arith.constant 0 : i32
    %c0_i32_1 = arith.constant 0 : i32
    return %c0_i32, %c0_i32_0 : i32, i32
  }
  func.func @transform_7(%arg0: i32) -> (i32, i32) {
    %c0_i32 = arith.constant 0 : i32
    %c0_i32_0 = arith.constant 0 : i32
    %c0_i32_1 = arith.constant 0 : i32
    return %c0_i32, %c0_i32_0 : i32, i32
  }
  func.func @transform_8(%arg0: i32) -> (i32, i32) {
    %c0_i32 = arith.constant 0 : i32
    %c0_i32_0 = arith.constant 0 : i32
    %c0_i32_1 = arith.constant 0 : i32
    return %c0_i32, %c0_i32_0 : i32, i32
  }
  func.func @transform_9(%arg0: i32) -> (i32, i32) {
    %c0_i32 = arith.constant 0 : i32
    %c0_i32_0 = arith.constant 0 : i32
    %c0_i32_1 = arith.constant 0 : i32
    return %c0_i32, %c0_i32_0 : i32, i32
  }
  func.func @transform_10(%arg0: i32) -> (i32, i32) {
    %c0_i32 = arith.constant 0 : i32
    %c0_i32_0 = arith.constant 0 : i32
    %c0_i32_1 = arith.constant 0 : i32
    return %c0_i32, %c0_i32_0 : i32, i32
  }
  func.func @transform_11(%arg0: i32) -> (i32, i32) {
    %c0_i32 = arith.constant 0 : i32
    %c0_i32_0 = arith.constant 0 : i32
    %c0_i32_1 = arith.constant 0 : i32
    return %c0_i32, %c0_i32_0 : i32, i32
  }
  func.func @transform_12(%arg0: i32) -> (i32, i32) {
    %c0_i32 = arith.constant 0 : i32
    %c0_i32_0 = arith.constant 0 : i32
    %c0_i32_1 = arith.constant 0 : i32
    return %c0_i32, %c0_i32_0 : i32, i32
  }
  func.func @transform_13(%arg0: i32) -> (i32, i32) {
    %c0_i32 = arith.constant 0 : i32
    %c0_i32_0 = arith.constant 0 : i32
    %c0_i32_1 = arith.constant 0 : i32
    return %c0_i32, %c0_i32_0 : i32, i32
  }
  func.func @transform_14(%arg0: i32) -> (i32, i32, i32) {
    %c0_i32 = arith.constant 0 : i32
    %c0_i32_0 = arith.constant 0 : i32
    %c0_i32_1 = arith.constant 0 : i32
    return %arg0, %c0_i32, %c0_i32_0 : i32, i32, i32
  }
}

</mosaic_0001>

<bundles_post_ra>
// kernel: tpu_custom_call.1
= control target key start
LH: loop header
LB: loop body
LE: loop exit
PB: predicated region body
PF: predicated region fallthrough
CT: control target
= control target key end

     0   :  { %s4280_s0 = inlined_call_operand.vmem [shape: bf16[2,16,64], index: 0, kind: input, shape index: {}]   ;;  %s4281_s1 = inlined_call_operand.hbm [shape: f32[2,16,256], index: 1, kind: input, shape index: {}]   ;;  %s4282_s2 = inlined_call_operand.vmem [shape: bf16[64,16], index: 2, kind: input, shape index: {}]   ;;  %s4283_s3 = inlined_call_operand.vmem [shape: f32[16,1], index: 3, kind: input, shape index: {}]   ;;  %s4284_s4 = inlined_call_operand.hbm [shape: f32[4,64,256], index: 4, kind: input, shape index: {}]   ;;  %s4285_s5 = inlined_call_operand.hbm [shape: f32[9,1,256], index: 5, kind: input, shape index: {}]   ;;  %s4286_s6 = inlined_call_operand.hbm [shape: bf16[16,288], index: 6, kind: input, shape index: {}]   ;;  %s4287_s7 = inlined_call_operand.vmem [shape: f32[16,1], index: 7, kind: input, shape index: {}]   ;;  %s4288_s8 = inlined_call_operand.vmem [shape: f32[16,256], index: 8, kind: input, shape index: {}]   ;;  %s4289_s9 = inlined_call_operand.vmem [shape: f32[16,256], index: 9, kind: input, shape index: {}]   ;;  %s4290_s10 = inlined_call_operand.hbm [shape: bf16[16,144], index: 10, kind: input, shape index: {}]   ;;  %s4291_s11 = inlined_call_operand.vmem [shape: f32[16,1], index: 11, kind: input, shape index: {}]   ;;  %s4292_s12 = inlined_call_operand.hbm [shape: f32[16,256], index: 12, kind: input, shape index: {}]   ;;  %s4293_s13 = inlined_call_operand.hbm [shape: f32[16,256], index: 13, kind: input, shape index: {}]   ;;  %s4294_s14 = inlined_call_operand.hbm [shape: f32[2,16,256], index: 14, kind: output, shape index: {}]  }
   0x1   :  { %4315 = sst [smem:[#allocation22_spill]] %s4280_s0 }
   0x2   :  { %4316 = sst [smem:[#allocation23_spill]] %s4284_s4 }
   0x3   :  { %4317 = sst [smem:[#allocation24_spill]] %s4285_s5 }
   0x4   :  { %4318 = sst [smem:[#allocation25_spill]] %s4286_s6 }
   0x5   :  { %4319 = sst [smem:[#allocation26_spill]] %s4287_s7 }
   0x6   :  { %4320 = sst [smem:[#allocation27_spill]] %s4288_s8 }
   0x7   :  { %4321 = sst [smem:[#allocation28_spill]] %s4289_s9 }
   0x8   :  { %4322 = sst [smem:[#allocation29_spill]] %s4290_s10 }
   0x9   :  { %4323 = sst [smem:[#allocation30_spill]] %s4291_s11 }
   0xa   :  { %4324 = sst [smem:[#allocation31_spill]] %s4294_s14 }
   0xb   :  { %19 = vsyncpa [#allocation5], 0 }
   0xc   :  { %21 = vsyncpa [#allocation5 + $0x1], 0 }
   0xd   :  { %22 = vsyncpa [#allocation8], 0 }
   0xe   :  { %23 = vsyncpa [#allocation11], 0 }
   0xf   :  { %24 = vsyncpa [#allocation14], 0 }
  0x10   :  { %25 = vsyncpa [#allocation6], 0 }
  0x11   :  { %27 = vsyncpa [#allocation6 + $0x1], 0  ;;  %s3371_s29 = smov 0   ;;  %s3373_s30 = smov 0  }
  0x12   :  { %s3375_s15 = smov 0   ;;  %s3377_s16 = smov 0  }
  0x13 LB: > { %s4325_s4 = sld [smem:[#allocation23_spill]]  ;;  %s3395_s20 = sadd.s32 4294967295, %s3269_s16   ;;  %s3269_s16 = sphi %s3377_s16, %s4355_s16   ;;  %s3265_s15 = sphi %s3375_s15, %s4354_s15   ;;  %s3261_s30 = sphi %s3373_s30, %s4353_s30   ;;  %s3257_s29 = sphi %s3371_s29, %s4352_s29  }
  0x14   : > { %p2466_p0 = scmp.ge.s32.totalorder %s3269_s16, 1  ;;  %p80_p1 = scmp.eq.s32.totalorder %s3395_s20, 0 }
  0x15   : > { %p368_p2 = scmp.lt.s32.totalorder %s3269_s16, 3  ;;  %s3271_s22 = smov [#allocation7]  }
  0x16   : > { %s387_s23 = sshll.u32 %s3271_s22, 4  ;;  %s4327_s6 = sld [smem:[#allocation25_spill]]  ;;  %s388_s23 = int_to_ptr.vmem [resolvable:$true] %s387_s23 }
  0x17   : > { %p3400_p3 = pnand %p2466_p0, %p368_p2  ;;  %s3272_s28 = smov [#allocation10]  }
  0x18   : > { %s415_s17 = sshll.u32 %s3272_s28, 4  ;;  %s4300_s18 = smov 256   ;;  %s416_s17 = int_to_ptr.vmem [resolvable:$true] %s415_s17 }
  0x19   : > { %s385_s19 = sshll.u32 %s4325_s4, 4  ;;  %p2877_p4 = pneg %p3400_p3  ;;  %s386_s19 = int_to_ptr.hbm [resolvable:$true] %s385_s19 }
  0x1a   : > { %s4301_s22 = smov 16   ;;  %s3275_s24 = smov 192  }
  0x1b   : > { %p3412_p6 = pnand %p2877_p4, %p80_p1  ;;  %s3276_s25 = smov 12  }
  0x1c   : > { %s413_s26 = sshll.u32 %s4327_s6, 4  ;;  %s453_s14 = sshll.u32 %s4292_s12, 4  ;;  %s414_s26 = int_to_ptr.hbm [resolvable:$true] %s413_s26  ;;  %s454_s14 = int_to_ptr.hbm [resolvable:$true] %s453_s14 }
  0x1d   : > { %2880 = dma.hbm_to_vmem [thread:$0]  (!%p3412_p6), %s386_s19, 8192, %s388_s23, [#allocation8], %s4300_s18, %s4300_s18, %s4301_s22  }
  0x1e   : > { %2886 = dma.hbm_to_vmem [thread:$0]  (!%p3412_p6), %s414_s26, 384, %s416_s17, [#allocation11], %s3275_s24, %s3275_s24, %s3276_s25  }
  0x1f   : > { %s3277_s11 = smov [#allocation13]   ;;  %s4329_s5 = sld [smem:[#allocation24_spill]] }
  0x20   : > { %s455_s28 = sshll.u32 %s3277_s11, 4  ;;  %s3278_s19 = smov [#allocation9]   ;;  %s456_s28 = int_to_ptr.vmem [resolvable:$true] %s455_s28 }
  0x21   : > { %2892 = dma.hbm_to_vmem [thread:$0]  (!%p3412_p6), %s454_s14, 512, %s456_s28, [#allocation14], %s4300_s18, %s4300_s18, %s4301_s22  }
  0x22   : > { %s401_s23 = sshll.u32 %s3278_s19, 4  ;;  %s3279_s4 = smov 32   ;;  %s402_s23 = int_to_ptr.vmem [resolvable:$true] %s401_s23 }
  0x23   : > { %s3280_s6 = smov 2   ;;  %s4330_s10 = sld [smem:[#allocation29_spill]] }
  0x24   : > { %s3281_s9 = smov [#allocation12]   ;;  %s467_s25 = sshll.u32 %s4293_s13, 4  ;;  %s468_s25 = int_to_ptr.hbm [resolvable:$true] %s467_s25 }
  0x25   : > { %s399_s7 = sshll.u32 %s4329_s5, 4  ;;  %s438_s14 = sshll.u32 %s3281_s9, 4  ;;  %s400_s7 = int_to_ptr.hbm [resolvable:$true] %s399_s7  ;;  %s439_s14 = int_to_ptr.vmem [resolvable:$true] %s438_s14 }
  0x26   : > { %2883 = dma.hbm_to_vmem [thread:$0]  (!%p3412_p6), %s400_s7, 288, %s402_s23, [#allocation8], %s3279_s4, %s3279_s4, %s3280_s6  }
  0x27   : > { %s3282_s7 = smov 128   ;;  %s3283_s28 = smov 8  }
  0x28   : > { %s3284_s19 = smov [#allocation15]   ;;  %s2465_s4 = sadd.s32 4294967294, %s3269_s16  }
  0x29   : > { %s436_s8 = sshll.u32 %s4330_s10, 4  ;;  %s469_s23 = sshll.u32 %s3284_s19, 4  ;;  %s437_s8 = int_to_ptr.hbm [resolvable:$true] %s436_s8  ;;  %s470_s23 = int_to_ptr.vmem [resolvable:$true] %s469_s23 }
  0x2a   : > { %2889 = dma.hbm_to_vmem [thread:$0]  (!%p3412_p6), %s437_s8, 256, %s439_s14, [#allocation11], %s3282_s7, %s3282_s7, %s3283_s28  }
  0x2b   : > { %2895 = dma.hbm_to_vmem [thread:$0]  (!%p3412_p6), %s468_s25, 512, %s470_s23, [#allocation14], %s4300_s18, %s4300_s18, %s4301_s22  }
  0x2c   : > { %s3451_s6 = sadd.s32 1, %s3269_s16   ;;  %s66_s26 = sadd.s32 1, %s3265_s15 }
  0x2d   : > { %s63_s11 = ssub.s32 %s3269_s16, %s3451_s6  ;;  %p73_p8 = scmp.ne.s32.totalorder %s3265_s15, %s3261_s30 }
  0x2e   : > { %p64_p7 = scmp.eq.s32.totalorder %s63_s11, 0  ;;  %p74_p9 = scmp.eq.s32.totalorder %s3269_s16, 0 }
  0x2f   : > { %p79_p10 = scmp.ne.s32.totalorder %s3261_s30, %s3257_s29  ;;  %p355_p13 = scmp.eq.s32.totalorder %s3395_s20, 1 }
  0x30   : > { %s3462_s8 = scalar_select %p64_p7, %s3265_s15, %s66_s26  }
  0x31   : > { %p3464_p11 = por %p74_p9, %p73_p8  ;;  %p3470_p12 = por %p80_p1, %p79_p10 }
  0x32   : > { %p361_p0 = scmp.eq.s32.totalorder %s2465_s4, 1  ;;  %p2910_p2 = scmp.lt.s32.totalorder %s3269_s16, 2 }
  0x33   : > { %s491_s14 = sand.u32 1, %s3265_s15   ;;  %p3477_p4 = por %p355_p13, %p73_p8 }
  0x34   : > { %p3481_p6 = por %p361_p0, %p79_p10  ;;  %s2474_s25 = sshll.u32 %s491_s14, 5 }
  0x35   : > { %s2774_s7 = sshll.u32 %s3269_s16, 5  ;;  %s495_s11 = scalar_lea.vmem [#allocation4], %s2474_s25 }
  0x36   : > { %s500_s23 = scalar_lea.hbm %s4281_s1, %s2774_s7  ;;  %s503_s26 = sshll.u32 %s495_s11, 4  ;;  %s504_s26 = int_to_ptr.vmem [resolvable:$true] %s503_s26 }
  0x37   : > { %s501_s18 = sshll.u32 %s500_s23, 4  ;;  %p3491_p7 = pnand %p2910_p2, %p3464_p11  ;;  %s502_s18 = int_to_ptr.hbm [resolvable:$true] %s501_s18 }
  0x38   : > { %s492_s22 = scalar_lea.sflag [#allocation5], %s491_s14  ;;  %s3161_s5 = sshra.s32 %s502_s18, 4  ;;  %s3162_s5 = int_to_ptr.hbm [resolvable:$true] %s3161_s5 }
  0x39   : > { %s3163_s10 = scalar_lea.hbm %s3162_s5, 32  ;;  %p3165_p9 = pneg %p3491_p7 }
  0x3a   : > { %p3164_p8 = scmp.ne.s32.totalorder %s3162_s5, %s3163_s10  ;;  %s3168_s28 = scalar_lea.hbm %s4281_s1, 64 }
  0x3b   : > { %p3169_p11 = scmp.lt.s32.totalorder %s3162_s5, %s4281_s1  ;;  %p3170_p0 = scmp.lt.s32.totalorder %s3168_s28, %s3163_s10 }
  0x3c   : > { %p3166_p10 = pnand %p3165_p9, %p3164_p8 }
  0x3d   : > { %p3171_p2 = por %p3170_p0, %p3169_p11 }
  0x3e   : > { %p3167_p13 = pneg %p3166_p10 }
  0x40   : > { %p3172_p5 = pnand %p3171_p2, %p3167_p13 }
  0x42   : > { %3175 = shalt.err (!%p3172_p5)
}
  0x43   : > { %s4336_s14 = smov 16   ;;  %s4337_s23 = smov 256  }
  0x44   : > { %2899 = dma.hbm_to_vmem [thread:$0]  (!%p3491_p7), %s502_s18, 512, %s504_s26, %s492_s22, %s4337_s23, %s4337_s23, %s4336_s14  }
  0x45   : > { %515 = sbr.rel (%p3400_p3) target bundleno = 2009 (0x7d9), region = 76  ;;  %s3511_s11 = sand.u32 (!%p3400_p3), 1, %s3261_s30  }
  0x46   : > { %s4302_s5 = sshll.u32 (!%p3400_p3), %s3511_s11, 5  ;;  %s518_s10 = scalar_lea.sflag (!%p3400_p3), [#allocation5], %s3511_s11 }
  0x47   : > { %s3517_s25 = scalar_lea.vmem (!%p3400_p3), [#allocation4], %s4302_s5 }
  0x4a   : > { %3236 = dma.done.wait (%p3470_p12), %s518_s10, 512  }
  0x4b   : > { %3238 = vsyncadd (%p3470_p12), %s518_s10, 4294966784 }
  0x4c   : > { %3240 = dma.done.wait (%p80_p1), [#allocation8], 8480  }
  0x4d   : > { %3242 = vsyncadd (%p80_p1), [#allocation8], 4294958816 }
  0x4e   : > { %3244 = dma.done.wait (%p80_p1), [#allocation11], 640  }
  0x4f   : > { %3246 = vsyncadd (%p80_p1), [#allocation11], 4294966656 }
  0x50   : > { %3248 = dma.done.wait (%p80_p1), [#allocation14], 1024  }
  0x51   : > { %3250 = vsyncadd (%p80_p1), [#allocation14], 4294966272  ;;  %p602_p3 = scmp.lt.s32.totalorder %s3395_s20, 1  ;;  %s4338_s0 = sld [smem:[#allocation22_spill]]  ;;  %v2777_v1 = vld [vmem:[%s4282_s2] sm:$0xff]  ;;  %vm644_vm0 = vcmask 130048  }
  0x52   : > { %v2778_v2 = vld [vmem:[%s4282_s2 + $0x8] sm:$0xff]  ;;  %v700_v3 = vld [vmem:[#allocation7 + $0x70] sm:$0xff]  ;;  %v698_v4 = vld [vmem:[#allocation7 + $0x60] sm:$0xff]  ;;  %vm719_vm1 = vcmask 523264   ;;  %v3285_v63 = vmov 0   ;;  %s4309_s4 = smov 15  }
  0x53   : > { %s603_s21 = scalar_select %p602_p3, %s3395_s20, 1  ;;  %786 = vmatpush.msra.mxu3 %v700_v3  ;;  %v696_v5 = vld [vmem:[#allocation7 + $0x50] sm:$0xff]  ;;  %v694_v6 = vld [vmem:[#allocation7 + $0x40] sm:$0xff]  ;;  %v2780_v11 = vld [vmem:[%s4282_s2 + $0x18] sm:$0xff]  ;;  %2975 = vset.pattern.permute.xlu0 %v3285_v63  ;;  %vm1655_vm10 = vcmask 261120  }
  0x54   : > { %v692_v7 = vld [vmem:[#allocation7 + $0x30] sm:$0xff]  ;;  %v690_v8 = vld [vmem:[#allocation7 + $0x20] sm:$0xff]  ;;  %v718_v14 = vld [vmem:[#allocation7 + $0xf8] sm:$0xff]  ;;  %2976 = vset.pattern.permute.xlu1 %v3285_v63  ;;  %s4307_s7 = smov 16   ;;  %s4305_s28 = smov 17  }
  0x55   : > { %s2775_s18 = sshll.u32 %s603_s21, 3  ;;  %787 = vmatpush.msra.mxu3 %v698_v4  ;;  %v688_v9 = vld [vmem:[#allocation7 + $0x10] sm:$0xff]  ;;  %v686_v12 = vld [vmem:[#allocation7] sm:$0xff]  ;;  %757 = vmatpush.msra.mxu2 %v718_v14  ;;  %v716_v16 = vld [vmem:[#allocation7 + $0xe8] sm:$0xff]  ;;  %s3291_s19 = smov 113  }
  0x56   : > { %v2779_v10 = vld [vmem:[%s4282_s2 + $0x10] sm:$0xff]  ;;  %v715_v15 = vld [vmem:[#allocation7 + $0xe0] sm:$0xff]  ;;  %v714_v18 = vld [vmem:[#allocation7 + $0xd8] sm:$0xff]  ;;  %s4303_s27 = smov 111   ;;  %s4313_s14 = smov 127  }
  0x57   : > { %s606_s26 = scalar_lea.vmem %s4338_s0, %s2775_s18  ;;  %788 = vmatpush.msra.mxu3 %v696_v5  ;;  %v717_v13 = vld [vmem:[#allocation7 + $0xf0] sm:$0xff]  ;;  %758 = vmatpush.msra.mxu2 %v716_v16  ;;  %v711_v19 = vld [vmem:[#allocation7 + $0xc0] sm:$0xff]  ;;  %v712_v20 = vld [vmem:[#allocation7 + $0xc8] sm:$0xff]  ;;  %s4339_s21 = sld [smem:[#allocation26_spill]] }
  0x58   : > { %v2776_v0 = vld [vmem:[%s606_s26] sm:$0xff]  ;;  %734 = vmatpush.msra.mxu1 %v717_v13  ;;  %v713_v17 = vld [vmem:[#allocation7 + $0xd0] sm:$0xff]  ;;  %v710_v22 = vld [vmem:[#allocation7 + $0xb8] sm:$0xff]  ;;  %s4311_s26 = smov 1   ;;  %s4340_s22 = sld [smem:[#allocation27_spill]] }
  0x59   : > { %664 = vmatpush.bf16.msra.mxu0 %v2776_v0  ;;  %789 = vmatpush.msra.mxu3 %v694_v6  ;;  %v709_v21 = vld [vmem:[#allocation7 + $0xb0] sm:$0xff]  ;;  %v707_v23 = vld [vmem:[#allocation7 + $0xa0] sm:$0xff]  ;;  %v708_v24 = vld [vmem:[#allocation7 + $0xa8] sm:$0xff]  ;;  %s4346_s10 = smov 17   ;;  %s4347_s5 = smov 111  }
  0x5a   : > { %735 = vmatpush.msra.mxu1 %v715_v15  ;;  %759 = vmatpush.msra.mxu2 %v714_v18  ;;  %v705_v25 = vld [vmem:[#allocation7 + $0x90] sm:$0xff]  ;;  %v706_v26 = vld [vmem:[#allocation7 + $0x98] sm:$0xff]  ;;  %v703_v27 = vld [vmem:[#allocation7 + $0x80] sm:$0xff]  ;;  %s4350_s18 = sshll.u32 %s3511_s11, 5 }
  0x5b   : > { %790 = vmatpush.msra.mxu3 %v692_v7  ;;  %v704_v28 = vld [vmem:[#allocation7 + $0x88] sm:$0xff]  ;;  %v701_v29 = vld [vmem:[#allocation7 + $0x78] sm:$0xff]  ;;  %v839_v30 = vld [vmem:[#allocation7 + $0x170] sm:$0xff] }
  0x5c   : > { %2508 = vmatmul.msk.bf16.vlgmr.msra.gmra.mxu0 %vm644_vm0, %v2777_v1  ;;  %736 = vmatpush.msra.mxu1 %v713_v17  ;;  %v840_v31 = vld [vmem:[#allocation7 + $0x178] sm:$0xff]  ;;  %v699_v32 = vld [vmem:[#allocation7 + $0x68] sm:$0xff]  ;;  %v837_v33 = vld [vmem:[#allocation7 + $0x160] sm:$0xff] }
  0x5d   : > { %791 = vmatpush.msra.mxu3 %v690_v8  ;;  %760 = vmatpush.msra.mxu2 %v712_v20  ;;  %v838_v34 = vld [vmem:[#allocation7 + $0x168] sm:$0xff]  ;;  %v697_v35 = vld [vmem:[#allocation7 + $0x58] sm:$0xff]  ;;  %v835_v36 = vld [vmem:[#allocation7 + $0x150] sm:$0xff] }
  0x5e   : > { %737 = vmatpush.msra.mxu1 %v711_v19  ;;  %v836_v37 = vld [vmem:[#allocation7 + $0x158] sm:$0xff]  ;;  %v695_v38 = vld [vmem:[#allocation7 + $0x48] sm:$0xff]  ;;  %v833_v39 = vld [vmem:[#allocation7 + $0x140] sm:$0xff] }
  0x5f   : > { %792 = vmatpush.msra.mxu3 %v688_v9  ;;  %761 = vmatpush.msra.mxu2 %v710_v22  ;;  %v834_v40 = vld [vmem:[#allocation7 + $0x148] sm:$0xff]  ;;  %v693_v41 = vld [vmem:[#allocation7 + $0x38] sm:$0xff]  ;;  %v831_v42 = vld [vmem:[#allocation7 + $0x130] sm:$0xff] }
  0x60   : > { %738 = vmatpush.msra.mxu1 %v709_v21  ;;  %v832_v43 = vld [vmem:[#allocation7 + $0x138] sm:$0xff]  ;;  %v691_v44 = vld [vmem:[#allocation7 + $0x28] sm:$0xff]  ;;  %v829_v45 = vld [vmem:[#allocation7 + $0x120] sm:$0xff] }
  0x61   : > { %793 = vmatpush.msra.mxu3 %v686_v12  ;;  %762 = vmatpush.msra.mxu2 %v708_v24  ;;  %v830_v46 = vld [vmem:[#allocation7 + $0x128] sm:$0xff]  ;;  %v689_v47 = vld [vmem:[#allocation7 + $0x18] sm:$0xff]  ;;  %v827_v48 = vld [vmem:[#allocation7 + $0x110] sm:$0xff] }
  0x62   : > { %739 = vmatpush.msra.mxu1 %v707_v23  ;;  %v828_v49 = vld [vmem:[#allocation7 + $0x118] sm:$0xff]  ;;  %v687_v50 = vld [vmem:[#allocation7 + $0x8] sm:$0xff]  ;;  %v825_v51 = vld [vmem:[#allocation7 + $0x100] sm:$0xff] }
  0x63   : > { %763 = vmatpush.msra.mxu2 %v706_v26  ;;  %878 = vmatpush.msrb.mxu3 %v840_v31  ;;  %v826_v52 = vld [vmem:[#allocation7 + $0x108] sm:$0xff]  ;;  %v912_v55 = vld [vmem:[#allocation7 + $0x1f0] sm:$0xff]  ;;  %v913_v56 = vld [vmem:[#allocation7 + $0x1f8] sm:$0xff] }
  0x64   : > { %740 = vmatpush.msra.mxu1 %v705_v25  ;;  %v910_v58 = vld [vmem:[#allocation7 + $0x1e0] sm:$0xff]  ;;  %v911_v59 = vld [vmem:[#allocation7 + $0x1e8] sm:$0xff]  ;;  %v908_v61 = vld [vmem:[#allocation7 + $0x1d0] sm:$0xff] }
  0x65   : > { %764 = vmatpush.msra.mxu2 %v704_v28  ;;  %879 = vmatpush.msrb.mxu3 %v838_v34  ;;  %v970_v60 = vld [vmem:[%s4283_s3] sm:$0xff]  ;;  %v909_v62 = vld [vmem:[#allocation7 + $0x1d8] sm:$0xff]  ;;  %v907_v1 = vld [vmem:[#allocation7 + $0x1c8] sm:$0xff] }
  0x66   : > { %741 = vmatpush.msra.mxu1 %v703_v27  ;;  %v906_v0 = vld [vmem:[#allocation7 + $0x1c0] sm:$0xff]  ;;  %974 = vperm.xlu0 %2975, %v970_v60   ;;  %v905_v3 = vld [vmem:[#allocation7 + $0x1b8] sm:$0xff]  ;;  %v903_v6 = vld [vmem:[#allocation7 + $0x1a8] sm:$0xff] }
  0x67   : > { %855 = vmatpush.msrb.mxu2 %v839_v30  ;;  %880 = vmatpush.msrb.mxu3 %v836_v37  ;;  %v902_v5 = vld [vmem:[#allocation7 + $0x1a0] sm:$0xff]  ;;  %v3566_v7 = vld [vmem:[%s3517_s25 + $0x8] sm:$0xff]  ;;  %v3572_v9 = vld [vmem:[%s3517_s25 + $0x10] sm:$0xff] }
  0x68   : > { %809 = vmatpush.msrb.mxu1 %v701_v29  ;;  %v971_v8 = vld [vmem:[%s4283_s3 + $0x8] sm:$0xff]  ;;  %1168 = vrot.lane.b32.xlu2 %v3566_v7, %s4311_s26  ;;  %v898_v12 = vld [vmem:[#allocation7 + $0x180] sm:$0xff]  ;;  %v3594_v17 = vld [vmem:[%s3517_s25 + $0x18] sm:$0xff] }
  0x69   : > { %856 = vmatpush.msrb.mxu2 %v837_v33  ;;  %881 = vmatpush.msrb.mxu3 %v834_v40  ;;  %v899_v13 = vld [vmem:[#allocation7 + $0x188] sm:$0xff]  ;;  %v3582_v15 = vld [vmem:[%s3517_s25] sm:$0xff]  ;;  %s3289_s25 = smov 112  }
  0x6a   : > { %810 = vmatpush.msrb.mxu1 %v699_v32  ;;  %1162 = vrot.lane.b32.xlu1 %v3572_v9, %s4311_s26 }
  0x6b   : > { %857 = vmatpush.msrb.mxu2 %v835_v36  ;;  %882 = vmatpush.msrb.mxu3 %v832_v43  ;;  %v998_v43 = vlaneseq }
  0x6c   : > { %2509 = vmatmul.msk.bf16.gmra.mxu0 %vm644_vm0, %v2778_v2  ;;  %811 = vmatpush.msrb.mxu1 %v697_v35  ;;  %v904_v2 = vld [vmem:[#allocation7 + $0x1b0] sm:$0xff] }
  0x6d   : > { %858 = vmatpush.msrb.mxu2 %v833_v39  ;;  %883 = vmatpush.msrb.mxu3 %v830_v46 }
  0x6e   : > { %812 = vmatpush.msrb.mxu1 %v695_v38  ;;  %979 = vperm.xlu0 %2975, %v971_v8  }
  0x6f   : > { %859 = vmatpush.msrb.mxu2 %v831_v42  ;;  %884 = vmatpush.msrb.mxu3 %v828_v49 }
  0x70   : > { %813 = vmatpush.msrb.mxu1 %v693_v41  ;;  %1112 = vrot.lane.b32.xlu2 %v3582_v15, %s4309_s4 }
  0x71   : > { %860 = vmatpush.msrb.mxu2 %v829_v45  ;;  %885 = vmatpush.msrb.mxu3 %v826_v52 }
  0x72   : > { %814 = vmatpush.msrb.mxu1 %v691_v44  ;;  %1120 = vrot.lane.b32.xlu1 %v3566_v7, %s4309_s4  ;;  %v1186_v44 = vld [vmem:[#allocation9 + $0x6] sm:$0x3] }
  0x73   : > { %861 = vmatpush.msrb.mxu2 %v827_v48  ;;  %v3655_v48 = vperm.slane %v1186_v44, 0  ;;  %v3657_v49 = vperm.slane %v1186_v44, 1 }
  0x74   : > { %815 = vmatpush.msrb.mxu1 %v689_v47  ;;  %v3653_v47 = vand.u32 127, %v998_v43 }
  0x75   : > { %862 = vmatpush.msrb.mxu2 %v825_v51 }
  0x76   : > { %816 = vmatpush.msrb.mxu1 %v687_v50  ;;  %1160 = vrot.lane.b32.xlu0 %v3582_v15, %s4311_s26  ;;  %vm1176_vm2 = vcmp.lt.s32.totalorder %v3653_v47, 1  ;;  %vm1128_vm3 = vcmp.lt.s32.totalorder %v3653_v47, 15  ;;  %vm1080_vm4 = vcmp.lt.s32.totalorder %v3653_v47, 16  ;;  %vm1328_vm5 = vcmp.lt.s32.totalorder %v3653_v47, 112 }
  0x77   : > { %vm1033_vm6 = vcmp.lt.s32.totalorder %v3653_v47, 17  ;;  %vm1280_vm7 = vcmp.lt.s32.totalorder %v3653_v47, 113  ;;  %vm1376_vm8 = vcmp.lt.s32.totalorder %v3653_v47, 111  ;;  %vm1232_vm9 = vcmp.lt.s32.totalorder %v3653_v47, 127 }
  0x78   : > { %1122 = vrot.lane.b32.xlu2 %v3594_v17, %s4309_s4 }
  0x7a   : > { %1072 = vrot.lane.b32.xlu1 %v3566_v7, %s4307_s7 }
  0x7c   : > { %2510 = vmatmul.msk.bf16.gmra.mxu0 %vm644_vm0, %v2779_v10  ;;  %v900_v10 = vld [vmem:[#allocation7 + $0x190] sm:$0xff] }
  0x7e   : > { %1170 = vrot.lane.b32.xlu0 %v3594_v17, %s4311_s26 }
  0x80   : > { %1064 = vrot.lane.b32.xlu2 %v3582_v15, %s4307_s7 }
  0x82   : > { %1314 = vrot.lane.b32.xlu1 %v3572_v9, %s3289_s25 }
  0x86   : > { %1114 = vrot.lane.b32.xlu0 %v3572_v9, %s4309_s4 }
  0x88   : > { %1074 = vrot.lane.b32.xlu2 %v3594_v17, %s4307_s7 }
  0x8a   : > { %1017 = vrot.lane.b32.xlu1 %v3572_v9, %s4305_s28 }
  0x8c   : > { %2511 = vmatmul.msk.bf16.gmra.mxu0 %vm644_vm0, %v2780_v11  ;;  %v901_v11 = vld [vmem:[#allocation7 + $0x198] sm:$0xff] }
  0x8e   : > { %1066 = vrot.lane.b32.xlu0 %v3572_v9, %s4307_s7 }
  0x90   : > { %1320 = vrot.lane.b32.xlu2 %v3566_v7, %s3289_s25 }
  0x92   : > { %1272 = vrot.lane.b32.xlu1 %v3566_v7, %s3291_s19 }
  0x96   : > { %1312 = vrot.lane.b32.xlu0 %v3582_v15, %s3289_s25 }
  0x98   : > { %1023 = vrot.lane.b32.xlu2 %v3566_v7, %s4305_s28 }
  0x9a   : > { %1362 = vrot.lane.b32.xlu1 %v3572_v9, %s4303_s27 }
  0x9e   : > { %1322 = vrot.lane.b32.xlu0 %v3594_v17, %s3289_s25 }
  0xa0   : > { %1264 = vrot.lane.b32.xlu2 %v3582_v15, %s3291_s19 }
  0xa6   : > { %1015 = vrot.lane.b32.xlu0 %v3582_v15, %s4305_s28 }
  0xa8   : > { %1274 = vrot.lane.b32.xlu2 %v3594_v17, %s3291_s19 }
  0xae   : > { %1025 = vrot.lane.b32.xlu0 %v3594_v17, %s4305_s28 }
  0xb6   : > { %1266 = vrot.lane.b32.xlu0 %v3572_v9, %s3291_s19 }
  0xbe   : > { %1360 = vrot.lane.b32.xlu0 %v3582_v15, %s4303_s27 }
  0xc2   : > { %v1169_v28 = vpop.permute.xlu2 %1168 }
  0xca   : > { %v3642_v35 = vpop.permute.xlu2 %1112 }
  0xd2   : > { %v1123_v52 = vpop.permute.xlu2 %1122 }
  0xd8   : > { %v975_v26 = vpop.permute.xlu0 %974 }
  0xd9   : > { %v666_v53 = vpop.f32.mrf.mxu0 }
  0xda   : > { %2516 = vmatmul.msk.f32.vlgmr.msra.gmra.mxu3 %vm719_vm1, %v666_v53 }
  0xe0   : > { %v980_v34 = vpop.permute.xlu0 %979 }
  0xe1   : > { %v668_v54 = vpop.f32.mrf.mxu0 }
  0xe2   : > { %2517 = vmatmul.msk.f32.gmra.mxu3 %vm719_vm1, %v668_v54 }
  0xe8   : > { %v1161_v46 = vpop.permute.xlu0 %1160 }
  0xe9   : > { %v671_v57 = vpop.f32.mrf.mxu0 }
  0xea   : > { %2512 = vmatmul.msk.f32.vlgmr.msra.gmra.mxu1 %vm719_vm1, %v671_v57  ;;  %2514 = vmatmul.msk.f32.vlgmr.msra.gmra.mxu2 %vm719_vm1, %v671_v57  ;;  %v1177_v57 = vsel %vm1176_vm2, %v1161_v46, %v1169_v28 }
  0xeb   : > { %928 = vmatpush.msra.mxu1 %v912_v55  ;;  %951 = vmatpush.msra.mxu2 %v913_v56 }
  0xed   : > { %929 = vmatpush.msra.mxu1 %v910_v58  ;;  %952 = vmatpush.msra.mxu2 %v911_v59  ;;  %v1181_v58 = vsel %vm1176_vm2, %v1169_v28, %v1161_v46 }
  0xee   : > { %v1192_v60 = vmul.f32 %v3655_v48, %v1181_v58 }
  0xef   : > { %930 = vmatpush.msra.mxu1 %v908_v61  ;;  %953 = vmatpush.msra.mxu2 %v909_v62  ;;  %v1193_v61 = vmul.f32 %v3657_v49, %v1177_v57 }
  0xf1   : > { %v673_v4 = vpop.f32.mrf.mxu0  ;;  %931 = vmatpush.msra.mxu1 %v906_v0  ;;  %954 = vmatpush.msra.mxu2 %v907_v1  ;;  %v1200_v1 = vpack.c.bf16 %v1193_v61, %v1192_v60 }
  0xf2   : > { %2513 = vmatmul.msk.f32.gmra.mxu1 %vm719_vm1, %v673_v4  ;;  %2515 = vmatmul.msk.f32.gmra.mxu2 %vm719_vm1, %v673_v4 }
  0xf3   : > { %932 = vmatpush.msra.mxu1 %v904_v2  ;;  %955 = vmatpush.msra.mxu2 %v905_v3  ;;  %v1171_v3 = vpop.permute.xlu0 %1170  ;;  %1204 = vst [vmem:[#allocation3 + $0x60] sm:$0xff] %v1200_v1 }
  0xf5   : > { %933 = vmatpush.msra.mxu1 %v902_v5  ;;  %956 = vmatpush.msra.mxu2 %v903_v6  ;;  %v3680_v6 = vpop.permute.xlu2 %1064 }
  0xf7   : > { %934 = vmatpush.msra.mxu1 %v900_v10  ;;  %957 = vmatpush.msra.mxu2 %v901_v11  ;;  %v1138_v10 = vld [vmem:[#allocation9 + $0x4] sm:$0x3] }
  0xf8   : > { %v3691_v11 = vperm.slane %v1138_v10, 0 }
  0xf9   : > { %v676_v14 = vpop.f32.mrf.mxu0  ;;  %935 = vmatpush.msra.mxu1 %v898_v12  ;;  %958 = vmatpush.msra.mxu2 %v899_v13  ;;  %v3693_v12 = vperm.slane %v1138_v10, 1 }
  0xfa   : > { %2518 = vmatmul.msk.f32.vlgmr.msrb.gmra.mxu1 %vm719_vm1, %v666_v53  ;;  %2520 = vmatmul.msk.f32.vlgmr.msrb.gmra.mxu2 %vm719_vm1, %v676_v14 }
  0xfb   : > { %2522 = vmatmul.msk.f32.vlgmr.msrb.gmra.mxu3 %vm719_vm1, %v676_v14  ;;  %v1115_v13 = vpop.permute.xlu0 %1114 }
  0xfc   : > { %v1130_v14 = vsel %vm1128_vm3, %v1115_v13, %v1123_v52 }
 0x101   : > { %v678_v16 = vpop.f32.mrf.mxu0 }
 0x102   : > { %2519 = vmatmul.msk.f32.gmra.mxu1 %vm719_vm1, %v668_v54  ;;  %2521 = vmatmul.msk.f32.gmra.mxu2 %vm719_vm1, %v678_v16 }
 0x103   : > { %2523 = vmatmul.msk.f32.gmra.mxu3 %vm719_vm1, %v678_v16  ;;  %v1134_v16 = vsel %vm1128_vm3, %v1123_v52, %v1115_v13  ;;  %v1067_v28 = vpop.permute.xlu0 %1066 }
 0x109   : > { %v681_v18 = vpop.f32.mrf.mxu0 }
 0x10a   : > { %2524 = vmatmul.msk.f32.vlgmr.msra.gmra.mxu1 %vm719_vm1, %v681_v18  ;;  %2526 = vmatmul.msk.f32.vlgmr.msra.gmra.mxu2 %vm719_vm1, %v681_v18  ;;  %v1146_v18 = vmul.f32 %v3691_v11, %v1134_v16 }
 0x111   : > { %v683_v19 = vpop.f32.mrf.mxu0 }
 0x112   : > { %2525 = vmatmul.msk.f32.gmra.mxu1 %vm719_vm1, %v683_v19  ;;  %2527 = vmatmul.msk.f32.gmra.mxu2 %vm719_vm1, %v683_v19  ;;  %v1147_v19 = vmul.f32 %v3693_v12, %v1130_v14 }
 0x15d   : > { %v795_v23 = vpop.f32.mrf.mxu3 }
 0x165   : > { %v798_v29 = vpop.f32.mrf.mxu3 }
 0x167   : > { %v743_v20 = vpop.f32.mrf.mxu1 }
 0x168   : > { %v796_v31 = vadd.f32 %v795_v23, %v743_v20  ;;  %v1153_v20 = vpack.c.bf16 %v1147_v19, %v1146_v18  ;;  %v1090_v23 = vld [vmem:[#allocation9 + $0x2] sm:$0x3] }
 0x16a   : > { %1157 = vst [vmem:[#allocation3 + $0x48] sm:$0xff] %v1153_v20 }
 0x16d   : > { %v766_v21 = vpop.f32.mrf.mxu2 }
 0x16f   : > { %v746_v22 = vpop.f32.mrf.mxu1 }
 0x170   : > { %v799_v50 = vadd.f32 %v798_v29, %v746_v22  ;;  %v1163_v22 = vpop.permute.xlu1 %1162 }
 0x175   : > { %v769_v24 = vpop.f32.mrf.mxu2 }
 0x177   : > { %v818_v25 = vpop.f32.mrf.mxu1 }
 0x178   : > { %v819_v39 = vadd.f32 %v818_v25, %v766_v21  ;;  %v1075_v21 = vpop.permute.xlu2 %1074  ;;  %v1182_v25 = vsel %vm1176_vm2, %v1171_v3, %v1163_v22 }
 0x179   : > { %v1194_v29 = vmul.f32 %v3655_v48, %v1182_v25 }
 0x17d   : > { %v864_v27 = vpop.f32.mrf.mxu2 }
 0x17e   : > { %v893_v33 = vadd.f32 %v864_v27, %v796_v31  ;;  %v887_v36 = vpop.f32.mrf.mxu3  ;;  %v3714_v27 = vperm.slane %v1090_v23, 1  ;;  %v1082_v31 = vsel %vm1080_vm4, %v1067_v28, %v1075_v21 }
 0x17f   : > { %v821_v30 = vpop.f32.mrf.mxu1  ;;  %v894_v41 = vadd.f32 %v887_v36, %v819_v39  ;;  %v1338_v39 = vld [vmem:[#allocation9 + $0xe] sm:$0x3] }
 0x180   : > { %v822_v53 = vadd.f32 %v821_v30, %v769_v24  ;;  %v1178_v24 = vsel %vm1176_vm2, %v1163_v22, %v1171_v3  ;;  %v3739_v46 = vperm.slane %v1338_v39, 1 }
 0x181   : > { %v1195_v30 = vmul.f32 %v3657_v49, %v1178_v24 }
 0x183   : > { %v1201_v36 = vpack.c.bf16 %v1195_v30, %v1194_v29 }
 0x185   : > { %v867_v32 = vpop.f32.mrf.mxu2  ;;  %1205 = vst [vmem:[#allocation3 + $0x68] sm:$0xff] %v1201_v36 }
 0x186   : > { %v890_v54 = vpop.f32.mrf.mxu3  ;;  %v895_v56 = vadd.f32 %v867_v32, %v799_v50  ;;  %v1086_v32 = vsel %vm1080_vm4, %v1075_v21, %v1067_v28  ;;  %v1313_v50 = vpop.permute.xlu0 %1312 }
 0x187   : > { %v937_v37 = vpop.f32.mrf.mxu1  ;;  %v896_v62 = vadd.f32 %v890_v54, %v822_v53 }
 0x188   : > { %v966_v38 = vadd.f32 %v937_v37, %v893_v33 }
 0x18a   : > { %v3644_v40 = vadd.f32 %v975_v26, %v966_v38  ;;  %v1121_v38 = vpop.permute.xlu1 %1120 }
 0x18b   : > { %v1133_v44 = vsel %vm1128_vm3, %v1121_v38, %v3642_v35 }
 0x18c   : > { %1268 = vrot.lane.b32.xlu2 %v3644_v40, %s3291_s19  ;;  %1068 = vrot.lane.b32.xlu0 %v3644_v40, %s4307_s7  ;;  %v1144_v52 = vmul.f32 %v3691_v11, %v1133_v44 }
 0x18d   : > { %1164 = vrot.lane.b32.xlu1 %v3644_v40, %s4311_s26  ;;  %v960_v42 = vpop.f32.mrf.mxu2 }
 0x18e   : > { %v967_v45 = vadd.f32 %v960_v42, %v894_v41  ;;  %v1321_v41 = vpop.permute.xlu2 %1320  ;;  %v1129_v42 = vsel %vm1128_vm3, %v3642_v35, %v1121_v38 }
 0x18f   : > { %v940_v55 = vpop.f32.mrf.mxu1  ;;  %v1145_v53 = vmul.f32 %v3693_v12, %v1129_v42  ;;  %v1329_v54 = vsel %vm1328_vm5, %v1313_v50, %v1321_v41 }
 0x190   : > { %v3659_v51 = vadd.f32 %v975_v26, %v967_v45  ;;  %v968_v63 = vadd.f32 %v940_v55, %v895_v56  ;;  %v3712_v26 = vperm.slane %v1090_v23, 0  ;;  %v3737_v45 = vperm.slane %v1338_v39, 0 }
 0x191   : > { %v1333_v55 = vsel %vm1328_vm5, %v1321_v41, %v1313_v50  ;;  %v1152_v35 = vpack.c.bf16 %v1145_v53, %v1144_v52 }
 0x192   : > { %v1210_v59 = vpack.c.bf16 %v3659_v51, %v3644_v40  ;;  %v3676_v4 = vadd.f32 %v980_v34, %v968_v63  ;;  %v1098_v33 = vmul.f32 %v3712_v26, %v1086_v32  ;;  %v1344_v56 = vmul.f32 %v3737_v45, %v1329_v54 }
 0x193   : > { %v1345_v57 = vmul.f32 %v3739_v46, %v1333_v55  ;;  %1156 = vst [vmem:[#allocation3 + $0x40] sm:$0xff] %v1152_v35 }
 0x194   : > { %1172 = vrot.lane.b32.xlu2 %v3659_v51, %s4311_s26  ;;  %1124 = vrot.lane.b32.xlu0 %v3659_v51, %s4309_s4  ;;  %1214 = vst [vmem:[#allocation3 + $0x90] sm:$0xff] %v1210_v59  ;;  %v1073_v59 = vpop.permute.xlu1 %1072 }
 0x195   : > { %1116 = vrot.lane.b32.xlu1 %v3644_v40, %s4309_s4  ;;  %v963_v0 = vpop.f32.mrf.mxu2  ;;  %v1352_v58 = vpack.c.bf16 %v1345_v57, %v1344_v56  ;;  %v1081_v60 = vsel %vm1080_vm4, %v3680_v6, %v1073_v59  ;;  %v1085_v61 = vsel %vm1080_vm4, %v1073_v59, %v3680_v6  ;;  %v1042_v6 = vld [vmem:[#allocation9] sm:$0x3] }
 0x196   : > { %v969_v2 = vadd.f32 %v963_v0, %v896_v62  ;;  %v1323_v62 = vpop.permute.xlu0 %1322  ;;  %v1096_v63 = vmul.f32 %v3712_v26, %v1085_v61  ;;  %v1097_v0 = vmul.f32 %v3714_v27, %v1081_v60  ;;  %v3774_v13 = vperm.slane %v1042_v6, 0  ;;  %v1448_v59 = vld [vmem:[%s4339_s21] sm:$0xff] }
 0x197   : > { %1356 = vst [vmem:[#allocation3 + $0xe0] sm:$0xff] %v1352_v58  ;;  %v3776_v14 = vperm.slane %v1042_v6, 1 }
 0x198   : > { %v3678_v5 = vadd.f32 %v980_v34, %v969_v2  ;;  %v1099_v34 = vmul.f32 %v3714_v27, %v1082_v31  ;;  %v1104_v1 = vpack.c.bf16 %v1097_v0, %v1096_v63  ;;  %v1024_v2 = vpop.permute.xlu2 %1023 }
 0x19a   : > { %v1211_v8 = vpack.c.bf16 %v3678_v5, %v3676_v4  ;;  %v1105_v37 = vpack.c.bf16 %v1099_v34, %v1098_v33  ;;  %1108 = vst [vmem:[#allocation3 + $0x20] sm:$0xff] %v1104_v1 }
 0x19c   : > { %1076 = vrot.lane.b32.xlu2 %v3659_v51, %s4307_s7  ;;  %1324 = vrot.lane.b32.xlu0 %v3659_v51, %s3289_s25  ;;  %1215 = vst [vmem:[#allocation3 + $0x98] sm:$0xff] %v1211_v8  ;;  %v1315_v3 = vpop.permute.xlu1 %1314 }
 0x19d   : > { %1316 = vrot.lane.b32.xlu1 %v3644_v40, %s3289_s25  ;;  %1109 = vst [vmem:[#allocation3 + $0x28] sm:$0xff] %v1105_v37  ;;  %v1330_v8 = vsel %vm1328_vm5, %v1315_v3, %v1323_v62  ;;  %v1334_v10 = vsel %vm1328_vm5, %v1323_v62, %v1315_v3  ;;  %v1290_v37 = vld [vmem:[#allocation9 + $0xc] sm:$0x3] }
 0x19e   : > { %v1016_v16 = vpop.permute.xlu0 %1015  ;;  %v1346_v18 = vmul.f32 %v3737_v45, %v1330_v8  ;;  %v1347_v19 = vmul.f32 %v3739_v46, %v1334_v10  ;;  %v3805_v41 = vperm.slane %v1290_v37, 0  ;;  %v3807_v42 = vperm.slane %v1290_v37, 1 }
 0x19f   : > { %v1034_v20 = vsel %vm1033_vm6, %v1016_v16, %v1024_v2  ;;  %v1038_v21 = vsel %vm1033_vm6, %v1024_v2, %v1016_v16 }
 0x1a0   : > { %v1048_v22 = vmul.f32 %v3774_v13, %v1038_v21  ;;  %v1049_v23 = vmul.f32 %v3776_v14, %v1034_v20  ;;  %v1353_v24 = vpack.c.bf16 %v1347_v19, %v1346_v18  ;;  %v1265_v28 = vpop.permute.xlu2 %1264 }
 0x1a2   : > { %v1056_v25 = vpack.c.bf16 %v1049_v23, %v1048_v22  ;;  %1357 = vst [vmem:[#allocation3 + $0xe8] sm:$0xff] %v1353_v24 }
 0x1a4   : > { %1027 = vrot.lane.b32.xlu0 %v3659_v51, %s4305_s28  ;;  %1118 = vrot.lane.b32.xlu2 %v3676_v4, %s4309_s4  ;;  %1060 = vst [vmem:[#allocation3] sm:$0xff] %v1056_v25  ;;  %v1018_v29 = vpop.permute.xlu1 %1017 }
 0x1a5   : > { %1019 = vrot.lane.b32.xlu1 %v3644_v40, %s4305_s28 }
 0x1a6   : > { %v1026_v30 = vpop.permute.xlu0 %1025 }
 0x1a7   : > { %v1035_v31 = vsel %vm1033_vm6, %v1018_v29, %v1026_v30  ;;  %v1039_v32 = vsel %vm1033_vm6, %v1026_v30, %v1018_v29 }
 0x1a8   : > { %v1050_v33 = vmul.f32 %v3774_v13, %v1039_v32  ;;  %v1051_v34 = vmul.f32 %v3776_v14, %v1035_v31  ;;  %v1275_v39 = vpop.permute.xlu2 %1274 }
 0x1aa   : > { %v1057_v36 = vpack.c.bf16 %v1051_v34, %v1050_v33 }
 0x1ac   : > { %1372 = vrot.lane.b32.xlu0 %v3659_v51, %s4303_s27  ;;  %1318 = vrot.lane.b32.xlu2 %v3676_v4, %s3289_s25  ;;  %1061 = vst [vmem:[#allocation3 + $0x8] sm:$0xff] %v1057_v36  ;;  %v1273_v38 = vpop.permute.xlu1 %1272 }
 0x1ad   : > { %1364 = vrot.lane.b32.xlu1 %v3644_v40, %s4303_s27  ;;  %v1281_v44 = vsel %vm1280_vm7, %v1265_v28, %v1273_v38 }
 0x1ae   : > { %v1267_v50 = vpop.permute.xlu0 %1266  ;;  %v1296_v54 = vmul.f32 %v3805_v41, %v1281_v44 }
 0x1af   : > { %v1282_v52 = vsel %vm1280_vm7, %v1267_v50, %v1275_v39  ;;  %v1286_v53 = vsel %vm1280_vm7, %v1275_v39, %v1267_v50 }
 0x1b0   : > { %v1298_v56 = vmul.f32 %v3805_v41, %v1282_v52  ;;  %v1299_v57 = vmul.f32 %v3807_v42, %v1286_v53 }
 0x1b2   : > { %v1305_v58 = vpack.c.bf16 %v1299_v57, %v1298_v56  ;;  %v1386_v56 = vld [vmem:[#allocation9 + $0x10] sm:$0x3] }
 0x1b4   : > { %1270 = vrot.lane.b32.xlu0 %v3676_v4, %s3291_s19  ;;  %1021 = vrot.lane.b32.xlu2 %v3676_v4, %s4305_s28  ;;  %1309 = vst [vmem:[#allocation3 + $0xc8] sm:$0xff] %v1305_v58  ;;  %v3848_v61 = vpop.permute.xlu1 %1362  ;;  %v3893_v58 = vperm.slane %v1386_v56, 1 }
 0x1b5   : > { %1276 = vrot.lane.b32.xlu1 %v3659_v51, %s3291_s19 }
 0x1b6   : > { %v3844_v60 = vpop.permute.xlu0 %1360 }
 0x1bc   : > { %1078 = vrot.lane.b32.xlu0 %v3678_v5, %s4307_s7  ;;  %1366 = vrot.lane.b32.xlu2 %v3676_v4, %s4303_s27 }
 0x1bd   : > { %1166 = vrot.lane.b32.xlu1 %v3676_v4, %s4311_s26 }
 0x1c4   : > { %1370 = vrot.lane.b32.xlu0 %v3594_v17, %s4303_s27  ;;  %1174 = vrot.lane.b32.xlu2 %v3678_v5, %s4311_s26  ;;  %s4342_s26 = smov 127  }
 0x1c5   : > { %1070 = vrot.lane.b32.xlu1 %v3676_v4, %s4307_s7 }
 0x1cc   : > { %1228 = vrot.lane.b32.xlu0 %v3659_v51, %s4313_s14  ;;  %1368 = vrot.lane.b32.xlu2 %v3566_v7, %s4303_s27  ;;  %v1285_v51 = vsel %vm1280_vm7, %v1273_v38, %v1265_v28 }
 0x1cd   : > { %1126 = vrot.lane.b32.xlu1 %v3678_v5, %s4309_s4  ;;  %v1297_v55 = vmul.f32 %v3807_v42, %v1285_v51  ;;  %s4343_s4 = smov 1  }
 0x1cf   : > { %v1304_v35 = vpack.c.bf16 %v1297_v55, %v1296_v54 }
 0x1d1   : > { %1308 = vst [vmem:[#allocation3 + $0xc0] sm:$0xff] %v1304_v35  ;;  %v3891_v35 = vperm.slane %v1386_v56, 0 }
 0x1d4   : > { %1218 = vrot.lane.b32.xlu0 %v3572_v9, %s4313_s14  ;;  %1222 = vrot.lane.b32.xlu2 %v3676_v4, %s4313_s14 }
 0x1d5   : > { %1220 = vrot.lane.b32.xlu1 %v3644_v40, %s4313_s14 }
 0x1dc   : > { %1452 = vperm.xlu0 %2975, %v1448_v59   ;;  %1278 = vrot.lane.b32.xlu2 %v3678_v5, %s3291_s19 }
 0x1dd   : > { %1326 = vrot.lane.b32.xlu1 %v3678_v5, %s3289_s25 }
 0x1e4   : > { %1216 = vrot.lane.b32.xlu2 %v3582_v15, %s4313_s14 }
 0x1e5   : > { %1029 = vrot.lane.b32.xlu1 %v3678_v5, %s4305_s28  ;;  %s4344_s28 = smov 15  }
 0x1e6   : > { %v3838_v4 = vpop.permute.xlu2 %1268 }
 0x1ec   : > { %1226 = vrot.lane.b32.xlu2 %v3594_v17, %s4313_s14 }
 0x1ed   : > { %1374 = vrot.lane.b32.xlu1 %v3678_v5, %s4303_s27  ;;  %s4348_s27 = sld [smem:[#allocation30_spill]] }
 0x1ee   : > { %v1173_v40 = vpop.permute.xlu2 %1172 }
 0x1f5   : > { %1230 = vrot.lane.b32.xlu1 %v3678_v5, %s4313_s14 }
 0x1f6   : > { %v1077_v62 = vpop.permute.xlu2 %1076 }
 0x1fd   : > { %1224 = vrot.lane.b32.xlu1 %v3566_v7, %s4313_s14  ;;  %s4341_s14 = sld [smem:[#allocation28_spill]] }
 0x1fe   : > { %v1069_v63 = vpop.permute.xlu0 %1068  ;;  %v3852_v0 = vpop.permute.xlu2 %1118 }
 0x1ff   : > { %v1083_v1 = vsel %vm1080_vm4, %v1069_v63, %v1077_v62  ;;  %v1087_v2 = vsel %vm1080_vm4, %v1077_v62, %v1069_v63  ;;  %v1165_v3 = vpop.permute.xlu1 %1164 }
 0x200   : > { %v1100_v6 = vmul.f32 %v3712_v26, %v1087_v2  ;;  %v1101_v5 = vmul.f32 %v3714_v27, %v1083_v1  ;;  %v1179_v8 = vsel %vm1176_vm2, %v1165_v3, %v1173_v40  ;;  %v1183_v10 = vsel %vm1176_vm2, %v1173_v40, %v1165_v3 }
 0x201   : > { %v1196_v16 = vmul.f32 %v3655_v48, %v1183_v10  ;;  %v1197_v18 = vmul.f32 %v3657_v49, %v1179_v8 }
 0x202   : > { %v1106_v19 = vpack.c.bf16 %v1101_v5, %v1100_v6 }
 0x203   : > { %v1202_v20 = vpack.c.bf16 %v1197_v18, %v1196_v16 }
 0x204   : > { %1110 = vst [vmem:[#allocation3 + $0x30] sm:$0xff] %v1106_v19 }
 0x205   : > { %1206 = vst [vmem:[#allocation3 + $0x70] sm:$0xff] %v1202_v20 }
 0x206   : > { %v1125_v21 = vpop.permute.xlu0 %1124  ;;  %v3866_v22 = vpop.permute.xlu2 %1318 }
 0x207   : > { %v1117_v23 = vpop.permute.xlu1 %1116 }
 0x208   : > { %v1131_v24 = vsel %vm1128_vm3, %v1117_v23, %v1125_v21  ;;  %v1135_v25 = vsel %vm1128_vm3, %v1125_v21, %v1117_v23 }
 0x209   : > { %v1148_v28 = vmul.f32 %v3691_v11, %v1135_v25  ;;  %v1149_v29 = vmul.f32 %v3693_v12, %v1131_v24 }
 0x20b   : > { %v1154_v30 = vpack.c.bf16 %v1149_v29, %v1148_v28 }
 0x20d   : > { %1158 = vst [vmem:[#allocation3 + $0x50] sm:$0xff] %v1154_v30 }
 0x20e   : > { %v1325_v31 = vpop.permute.xlu0 %1324  ;;  %v3874_v32 = vpop.permute.xlu2 %1021 }
 0x20f   : > { %v1317_v33 = vpop.permute.xlu1 %1316 }
 0x210   : > { %v1331_v34 = vsel %vm1328_vm5, %v1317_v33, %v1325_v31  ;;  %v1335_v36 = vsel %vm1328_vm5, %v1325_v31, %v1317_v33 }
 0x211   : > { %v1348_v37 = vmul.f32 %v3737_v45, %v1331_v34  ;;  %v1349_v38 = vmul.f32 %v3739_v46, %v1335_v36 }
 0x213   : > { %v1354_v39 = vpack.c.bf16 %v1349_v38, %v1348_v37 }
 0x215   : > { %1358 = vst [vmem:[#allocation3 + $0xf0] sm:$0xff] %v1354_v39 }
 0x216   : > { %v1028_v44 = vpop.permute.xlu0 %1027  ;;  %v3882_v51 = vpop.permute.xlu2 %1366 }
 0x217   : > { %v1020_v50 = vpop.permute.xlu1 %1019 }
 0x218   : > { %v1036_v52 = vsel %vm1033_vm6, %v1020_v50, %v1028_v44  ;;  %v1040_v53 = vsel %vm1033_vm6, %v1028_v44, %v1020_v50 }
 0x219   : > { %v1052_v54 = vmul.f32 %v3774_v13, %v1040_v53  ;;  %v1053_v55 = vmul.f32 %v3776_v14, %v1036_v52 }
 0x21b   : > { %v1058_v57 = vpack.c.bf16 %v1053_v55, %v1052_v54 }
 0x21d   : > { %1062 = vst [vmem:[#allocation3 + $0x10] sm:$0xff] %v1058_v57 }
 0x21e   : > { %v1373_v59 = vpop.permute.xlu0 %1372  ;;  %v1175_v40 = vpop.permute.xlu2 %1174 }
 0x21f   : > { %v1365_v62 = vpop.permute.xlu1 %1364 }
 0x220   : > { %v1379_v63 = vsel %vm1376_vm8, %v1365_v62, %v1373_v59  ;;  %v1383_v1 = vsel %vm1376_vm8, %v1373_v59, %v1365_v62 }
 0x221   : > { %v1396_v2 = vmul.f32 %v3891_v35, %v1379_v63  ;;  %v1397_v3 = vmul.f32 %v3893_v58, %v1383_v1  ;;  %v2599_v1 = vld [vmem:[#allocation3 + $0x70] sm:$0xf] }
 0x223   : > { %v1402_v6 = vpack.c.bf16 %v1397_v3, %v1396_v2  ;;  %v2798_v2 = vld [vmem:[#allocation3 + $0x74] sm:$0xf] }
 0x225   : > { %1406 = vst [vmem:[#allocation3 + $0x110] sm:$0xff] %v1402_v6 }
 0x226   : > { %v1271_v5 = vpop.permute.xlu0 %1270  ;;  %v1369_v8 = vpop.permute.xlu2 %1368 }
 0x227   : > { %v1277_v10 = vpop.permute.xlu1 %1276  ;;  %v1377_v16 = vsel %vm1376_vm8, %v3844_v60, %v1369_v8  ;;  %v1381_v18 = vsel %vm1376_vm8, %v1369_v8, %v3844_v60  ;;  %v2591_v8 = vld [vmem:[#allocation3 + $0x60] sm:$0xf] }
 0x228   : > { %v1283_v19 = vsel %vm1280_vm7, %v3838_v4, %v1277_v10  ;;  %v1287_v20 = vsel %vm1280_vm7, %v1277_v10, %v3838_v4  ;;  %v1392_v21 = vmul.f32 %v3891_v35, %v1377_v16  ;;  %v1393_v23 = vmul.f32 %v3893_v58, %v1381_v18  ;;  %v2797_v10 = vld [vmem:[#allocation3 + $0x64] sm:$0xf0]  ;;  %v2796_v16 = vld [vmem:[#allocation3 + $0x64] sm:$0xf]  ;;  %v2593_v18 = vld [vmem:[#allocation3 + $0x68] sm:$0xf0] }
 0x229   : > { %v1300_v24 = vmul.f32 %v3805_v41, %v1283_v19  ;;  %v1301_v25 = vmul.f32 %v3807_v42, %v1287_v20 }
 0x22a   : > { %v1400_v28 = vpack.c.bf16 %v1393_v23, %v1392_v21  ;;  %v2592_v23 = vor.u32 %v2797_v10, %v2591_v8  ;;  %v2567_v10 = vld [vmem:[#allocation3 + $0x30] sm:$0xf] }
 0x22b   : > { %v1306_v29 = vpack.c.bf16 %v1301_v25, %v1300_v24  ;;  %v2596_v24 = vor.u32 %v2796_v16, %v2593_v18  ;;  %v1242_v25 = vld [vmem:[#allocation9 + $0xa] sm:$0x3]  ;;  %v2790_v16 = vld [vmem:[#allocation3 + $0x34] sm:$0xf] }
 0x22c   : > { %1404 = vst [vmem:[#allocation3 + $0x100] sm:$0xff] %v1400_v28 }
 0x22d   : > { %1310 = vst [vmem:[#allocation3 + $0xd0] sm:$0xff] %v1306_v29 }
 0x22e   : > { %v1079_v60 = vpop.permute.xlu0 %1078  ;;  %v3917_v30 = vpop.permute.xlu2 %1222 }
 0x22f   : > { %v1167_v31 = vpop.permute.xlu1 %1166 }
 0x230   : > { %v1180_v33 = vsel %vm1176_vm2, %v1167_v31, %v1175_v40  ;;  %v1184_v4 = vsel %vm1176_vm2, %v1175_v40, %v1167_v31  ;;  %v3956_v31 = vperm.slane %v1242_v25, 1 }
 0x231   : > { %v1198_v34 = vmul.f32 %v3655_v48, %v1184_v4  ;;  %v1199_v36 = vmul.f32 %v3657_v49, %v1180_v33 }
 0x233   : > { %v1203_v37 = vpack.c.bf16 %v1199_v36, %v1198_v34  ;;  %v2575_v36 = vld [vmem:[#allocation3 + $0x40] sm:$0xf] }
 0x235   : > { %1207 = vst [vmem:[#allocation3 + $0x78] sm:$0xff] %v1203_v37  ;;  %v2793_v37 = vld [vmem:[#allocation3 + $0x44] sm:$0xf0] }
 0x236   : > { %v1371_v38 = vpop.permute.xlu0 %1370  ;;  %v1279_v39 = vpop.permute.xlu2 %1278 }
 0x237   : > { %v1378_v44 = vsel %vm1376_vm8, %v3848_v61, %v1371_v38  ;;  %v1382_v50 = vsel %vm1376_vm8, %v1371_v38, %v3848_v61  ;;  %v1284_v52 = vsel %vm1280_vm7, %v1271_v5, %v1279_v39  ;;  %v1288_v48 = vsel %vm1280_vm7, %v1279_v39, %v1271_v5  ;;  %v1071_v53 = vpop.permute.xlu1 %1070  ;;  %v2583_v39 = vld [vmem:[#allocation3 + $0x50] sm:$0xf] }
 0x238   : > { %v1394_v49 = vmul.f32 %v3891_v35, %v1378_v44  ;;  %v1395_v54 = vmul.f32 %v3893_v58, %v1382_v50  ;;  %v1302_v55 = vmul.f32 %v3805_v41, %v1284_v52  ;;  %v1303_v56 = vmul.f32 %v3807_v42, %v1288_v48  ;;  %v2792_v44 = vld [vmem:[#allocation3 + $0x44] sm:$0xf]  ;;  %v2577_v50 = vld [vmem:[#allocation3 + $0x48] sm:$0xf0]  ;;  %v2794_v48 = vld [vmem:[#allocation3 + $0x54] sm:$0xf] }
 0x239   : > { %v1084_v57 = vsel %vm1080_vm4, %v1071_v53, %v1079_v60  ;;  %v1088_v61 = vsel %vm1080_vm4, %v1079_v60, %v1071_v53  ;;  %v3954_v60 = vperm.slane %v1242_v25, 0 }
 0x23a   : > { %v1401_v59 = vpack.c.bf16 %v1395_v54, %v1394_v49  ;;  %v1307_v40 = vpack.c.bf16 %v1303_v56, %v1302_v55  ;;  %v1102_v62 = vmul.f32 %v3712_v26, %v1088_v61  ;;  %v1103_v63 = vmul.f32 %v3714_v27, %v1084_v57 }
 0x23b   : > { %v2576_v57 = vor.u32 %v2793_v37, %v2575_v36  ;;  %v2580_v61 = vor.u32 %v2792_v44, %v2577_v50  ;;  %v2813_v37 = vld [vmem:[#allocation3 + $0xe4] sm:$0xf0]  ;;  %v2551_v44 = vld [vmem:[#allocation3 + $0x10] sm:$0xf]  ;;  %v2786_v50 = vld [vmem:[#allocation3 + $0x14] sm:$0xf] }
 0x23c   : > { %1405 = vst [vmem:[#allocation3 + $0x108] sm:$0xff] %v1401_v59  ;;  %v1107_v3 = vpack.c.bf16 %v1103_v63, %v1102_v62  ;;  %v2799_v6 = vld [vmem:[#allocation3 + $0x74] sm:$0xf0]  ;;  %v2601_v41 = vld [vmem:[#allocation3 + $0x78] sm:$0xf0] }
 0x23d   : > { %1311 = vst [vmem:[#allocation3 + $0xd8] sm:$0xff] %v1307_v40  ;;  %v2600_v42 = vor.u32 %v2799_v6, %v2599_v1  ;;  %v2604_v5 = vor.u32 %v2798_v2, %v2601_v41 }
 0x23e   : > { %1111 = vst [vmem:[#allocation3 + $0x38] sm:$0xff] %v1107_v3  ;;  %v1229_v29 = vpop.permute.xlu0 %1228  ;;  %v3958_v33 = vpop.permute.xlu2 %1216 }
 0x23f   : > { %1659 = vmatpush.bf16.msra.mxu3 %v2600_v42  ;;  %1701 = vmatpush.bf16.msrb.mxu2 %v2604_v5  ;;  %v1127_v19 = vpop.permute.xlu1 %1126 }
 0x240   : > { %v1132_v26 = vsel %vm1128_vm3, %v3852_v0, %v1127_v19  ;;  %v1136_v27 = vsel %vm1128_vm3, %v1127_v19, %v3852_v0 }
 0x241   : > { %v1150_v20 = vmul.f32 %v3691_v11, %v1136_v27  ;;  %v1151_v21 = vmul.f32 %v3693_v12, %v1132_v26  ;;  %v2559_v26 = vld [vmem:[#allocation3 + $0x20] sm:$0xf]  ;;  %v2789_v27 = vld [vmem:[#allocation3 + $0x24] sm:$0xf0] }
 0x243   : > { %v1155_v28 = vpack.c.bf16 %v1151_v21, %v1150_v20  ;;  %1660 = vmatpush.bf16.msra.mxu3 %v2592_v23  ;;  %1702 = vmatpush.bf16.msrb.mxu2 %v2596_v24  ;;  %v2561_v20 = vld [vmem:[#allocation3 + $0x28] sm:$0xf0] }
 0x245   : > { %1159 = vst [vmem:[#allocation3 + $0x58] sm:$0xff] %v1155_v28  ;;  %v2791_v42 = vld [vmem:[#allocation3 + $0x34] sm:$0xf0]  ;;  %v2569_v5 = vld [vmem:[#allocation3 + $0x38] sm:$0xf0]  ;;  %v2560_v28 = vor.u32 %v2789_v27, %v2559_v26 }
 0x246   : > { %v1219_v55 = vpop.permute.xlu0 %1218  ;;  %v1227_v59 = vpop.permute.xlu2 %1226  ;;  %v2568_v18 = vor.u32 %v2791_v42, %v2567_v10  ;;  %v2572_v19 = vor.u32 %v2790_v16, %v2569_v5  ;;  %v2818_v16 = vld [vmem:[#allocation3 + $0x114] sm:$0xf]  ;;  %v2673_v27 = vld [vmem:[#allocation3 + $0x108] sm:$0xf0] }
 0x247   : > { %v1221_v0 = vpop.permute.xlu1 %1220  ;;  %v1234_v63 = vsel %vm1232_vm9, %v1219_v55, %v1227_v59  ;;  %v1238_v1 = vsel %vm1232_vm9, %v1227_v59, %v1219_v55  ;;  %v2545_v59 = vld [vmem:[#allocation3 + $0x8] sm:$0xf0] }
 0x248   : > { %v1235_v11 = vsel %vm1232_vm9, %v1221_v0, %v1229_v29  ;;  %v1239_v12 = vsel %vm1232_vm9, %v1229_v29, %v1221_v0  ;;  %v1250_v6 = vmul.f32 %v3954_v60, %v1234_v63  ;;  %v1251_v41 = vmul.f32 %v3956_v31, %v1238_v1 }
 0x249   : > { %v1252_v4 = vmul.f32 %v3954_v60, %v1235_v11  ;;  %v1253_v34 = vmul.f32 %v3956_v31, %v1239_v12  ;;  %v2663_v11 = vld [vmem:[#allocation3 + $0xf0] sm:$0xf] }
 0x24b   : > { %v1258_v38 = vpack.c.bf16 %v1253_v34, %v1252_v4  ;;  %v1208_v4 = vpack.c.bf16 %v3566_v7, %v3582_v15  ;;  %v1209_v34 = vpack.c.bf16 %v3594_v17, %v3572_v9  ;;  %v2811_v17 = vld [vmem:[#allocation3 + $0xd4] sm:$0xf0] }
 0x24c   : > { %v2795_v52 = vld [vmem:[#allocation3 + $0x54] sm:$0xf0]  ;;  %v2585_v53 = vld [vmem:[#allocation3 + $0x58] sm:$0xf0] }
 0x24d   : > { %1262 = vst [vmem:[#allocation3 + $0xb0] sm:$0xff] %v1258_v38  ;;  %v2584_v49 = vor.u32 %v2795_v52, %v2583_v39  ;;  %v2588_v54 = vor.u32 %v2794_v48, %v2585_v53  ;;  %v2647_v48 = vld [vmem:[#allocation3 + $0xd0] sm:$0xf] }
 0x24e   : > { %1212 = vst [vmem:[#allocation3 + $0x80] sm:$0xff] %v1208_v4  ;;  %v2814_v4 = vld [vmem:[#allocation3 + $0xf4] sm:$0xf] }
 0x24f   : > { %1661 = vmatpush.bf16.msra.mxu3 %v2584_v49  ;;  %1703 = vmatpush.bf16.msrb.mxu2 %v2588_v54  ;;  %v1327_v56 = vpop.permute.xlu1 %1326  ;;  %1213 = vst [vmem:[#allocation3 + $0x88] sm:$0xff] %v1209_v34  ;;  %v2648_v54 = vor.u32 %v2811_v17, %v2647_v48 }
 0x250   : > { %v1332_v40 = vsel %vm1328_vm5, %v3866_v22, %v1327_v56  ;;  %v1336_v62 = vsel %vm1328_vm5, %v1327_v56, %v3866_v22  ;;  %v1257_v22 = vpack.c.bf16 %v1251_v41, %v1250_v6  ;;  %v2543_v56 = vld [vmem:[#allocation3] sm:$0xf] }
 0x251   : > { %v1350_v2 = vmul.f32 %v3737_v45, %v1332_v40  ;;  %v1351_v3 = vmul.f32 %v3739_v46, %v1336_v62  ;;  %v2788_v45 = vld [vmem:[#allocation3 + $0x24] sm:$0xf]  ;;  %v2531_v40 = vld [vmem:[#allocation10] sm:$0xf]  ;;  %v2782_v62 = vld [vmem:[#allocation10 + $0x8] sm:$0xf0] }
 0x252   : > { %1261 = vst [vmem:[#allocation3 + $0xa8] sm:$0xff] %v1257_v22  ;;  %v2564_v29 = vor.u32 %v2788_v45, %v2561_v20  ;;  %v2532_v5 = vor.u32 %v2782_v62, %v2531_v40  ;;  %v2679_v22 = vld [vmem:[#allocation3 + $0x110] sm:$0xf]  ;;  %v2781_v40 = vld [vmem:[#allocation10 + $0x4] sm:$0xf] }
 0x253   : > { %v1355_v8 = vpack.c.bf16 %v1351_v3, %v1350_v2  ;;  %1662 = vmatpush.bf16.msra.mxu3 %v2576_v57  ;;  %1704 = vmatpush.bf16.msrb.mxu2 %v2580_v61  ;;  %v2785_v57 = vld [vmem:[#allocation3 + $0x4] sm:$0xf0]  ;;  %v2533_v62 = vld [vmem:[#allocation10 + $0xc] sm:$0xf0] }
 0x254   : > { %v2809_v61 = vld [vmem:[#allocation3 + $0xc4] sm:$0xf0]  ;;  %v2544_v6 = vor.u32 %v2785_v57, %v2543_v56 }
 0x255   : > { %1359 = vst [vmem:[#allocation3 + $0xf8] sm:$0xff] %v1355_v8 }
 0x256   : > { %v2801_v56 = vld [vmem:[#allocation3 + $0x84] sm:$0xf0] }
 0x257   : > { %1663 = vmatpush.bf16.msra.mxu3 %v2568_v18  ;;  %1705 = vmatpush.bf16.msrb.mxu2 %v2572_v19  ;;  %v1030_v46 = vpop.permute.xlu1 %1029 }
 0x258   : > { %v1037_v21 = vsel %vm1033_vm6, %v3874_v32, %v1030_v46  ;;  %v1041_v23 = vsel %vm1033_vm6, %v1030_v46, %v3874_v32  ;;  %v2655_v32 = vld [vmem:[#allocation3 + $0xe0] sm:$0xf]  ;;  %v2539_v46 = vld [vmem:[#allocation10 + $0x8] sm:$0xf] }
 0x259   : > { %v1054_v24 = vmul.f32 %v3774_v13, %v1041_v23  ;;  %v1055_v25 = vmul.f32 %v3776_v14, %v1037_v21  ;;  %v2656_v15 = vor.u32 %v2813_v37, %v2655_v32  ;;  %v2783_v21 = vld [vmem:[#allocation10 + $0x10] sm:$0xf0] }
 0x25a   : > { %v2540_v32 = vor.u32 %v2783_v21, %v2539_v46  ;;  %v2805_v17 = vld [vmem:[#allocation3 + $0xa4] sm:$0xf0] }
 0x25b   : > { %v1059_v0 = vpack.c.bf16 %v1055_v25, %v1054_v24  ;;  %1664 = vmatpush.bf16.msra.mxu3 %v2560_v28  ;;  %1706 = vmatpush.bf16.msrb.mxu2 %v2564_v29  ;;  %v2671_v25 = vld [vmem:[#allocation3 + $0x100] sm:$0xf]  ;;  %v1449_v28 = vld [vmem:[%s4339_s21 + $0x8] sm:$0xff] }
 0x25c   : > { %v2815_v12 = vld [vmem:[#allocation3 + $0xf4] sm:$0xf0]  ;;  %v2665_v20 = vld [vmem:[#allocation3 + $0xf8] sm:$0xf0]  ;;  %1457 = vperm.xlu1 %2976, %v1449_v28  }
 0x25d   : > { %1063 = vst [vmem:[#allocation3 + $0x18] sm:$0xff] %v1059_v0  ;;  %v2664_v36 = vor.u32 %v2815_v12, %v2663_v11  ;;  %v2816_v12 = vld [vmem:[#allocation3 + $0x104] sm:$0xf] }
 0x25e   : > { %v2676_v34 = vor.u32 %v2816_v12, %v2673_v27  ;;  %v999_v27 = vshrl.u32 %v998_v43, 7  ;;  %v3294_v12 = vmov 0.0  }
 0x25f   : > { %1673 = vmatpush.bf16.msrb.mxu0 %v2664_v36  ;;  %v1375_v13 = vpop.permute.xlu1 %1374  ;;  %v2668_v36 = vor.u32 %v2814_v4, %v2665_v20 }
 0x260   : > { %v1380_v14 = vsel %vm1376_vm8, %v3882_v51, %v1375_v13  ;;  %v1384_v38 = vsel %vm1376_vm8, %v1375_v13, %v3882_v51  ;;  %v2639_v51 = vld [vmem:[#allocation3 + $0xc0] sm:$0xf]  ;;  %v2812_v13 = vld [vmem:[#allocation3 + $0xe4] sm:$0xf]  ;;  %vm1001_vm11 = vcmp.lt.s32.totalorder %v999_v27, 4 }
 0x261   : > { %v1398_v7 = vmul.f32 %v3891_v35, %v1380_v14  ;;  %v1399_v9 = vmul.f32 %v3893_v58, %v1384_v38  ;;  %v2784_v35 = vld [vmem:[#allocation3 + $0x4] sm:$0xf]  ;;  %v2640_v41 = vor.u32 %v2809_v61, %v2639_v51  ;;  %v2631_v14 = vld [vmem:[#allocation3 + $0xb0] sm:$0xf]  ;;  %v2806_v51 = vld [vmem:[#allocation3 + $0xb4] sm:$0xf] }
 0x262   : > { %v2548_v42 = vor.u32 %v2784_v35, %v2545_v59  ;;  %v2625_v35 = vld [vmem:[#allocation3 + $0xa8] sm:$0xf0]  ;;  %v4022_v4 = vsel %vm1001_vm11, 1.0, %v3294_v12 }
 0x263   : > { %v1403_v39 = vpack.c.bf16 %v1399_v9, %v1398_v7  ;;  %1674 = vmatpush.bf16.msrb.mxu0 %v2656_v15  ;;  %v2810_v9 = vld [vmem:[#allocation3 + $0xd4] sm:$0xf] }
 0x264   : > { %v2787_v52 = vld [vmem:[#allocation3 + $0x14] sm:$0xf0]  ;;  %v2553_v53 = vld [vmem:[#allocation3 + $0x18] sm:$0xf0] }
 0x265   : > { %1407 = vst [vmem:[#allocation3 + $0x118] sm:$0xff] %v1403_v39  ;;  %v2552_v49 = vor.u32 %v2787_v52, %v2551_v44  ;;  %v2556_v55 = vor.u32 %v2786_v50, %v2553_v53  ;;  %v2808_v39 = vld [vmem:[#allocation3 + $0xc4] sm:$0xf]  ;;  %v2641_v44 = vld [vmem:[#allocation3 + $0xc8] sm:$0xf0] }
 0x266   : > { %v2644_v48 = vor.u32 %v2808_v39, %v2641_v44  ;;  %v2803_v53 = vld [vmem:[#allocation3 + $0x94] sm:$0xf0] }
 0x267   : > { %1665 = vmatpush.bf16.msra.mxu3 %v2552_v49  ;;  %1675 = vmatpush.bf16.msrb.mxu0 %v2648_v54  ;;  %v1231_v58 = vpop.permute.xlu1 %1230  ;;  %v2615_v54 = vld [vmem:[#allocation3 + $0x90] sm:$0xf] }
 0x268   : > { %1707 = vmatpush.bf16.msrb.mxu2 %v2556_v55  ;;  %v1236_v63 = vsel %vm1232_vm9, %v3917_v30, %v1231_v58  ;;  %v1240_v1 = vsel %vm1232_vm9, %v1231_v58, %v3917_v30  ;;  %v2817_v30 = vld [vmem:[#allocation3 + $0x104] sm:$0xf0]  ;;  %v2607_v55 = vld [vmem:[#allocation3 + $0x80] sm:$0xf]  ;;  %v2616_v57 = vor.u32 %v2803_v53, %v2615_v54 }
 0x269   : > { %v1254_v2 = vmul.f32 %v3954_v60, %v1236_v63  ;;  %v1255_v3 = vmul.f32 %v3956_v31, %v1240_v1  ;;  %v2672_v11 = vor.u32 %v2817_v30, %v2671_v25  ;;  %v2608_v58 = vor.u32 %v2801_v56, %v2607_v55 }
 0x26a   : > { %v2536_v1 = vor.u32 %v2781_v40, %v2533_v62 }
 0x26b   : > { %v1259_v8 = vpack.c.bf16 %v1255_v3, %v1254_v2  ;;  %1666 = vmatpush.bf16.msra.mxu3 %v2544_v6  ;;  %1676 = vmatpush.bf16.msrb.mxu0 %v2640_v41  ;;  %v2617_v2 = vld [vmem:[#allocation3 + $0x98] sm:$0xf0]  ;;  %v2802_v3 = vld [vmem:[#allocation3 + $0x94] sm:$0xf]  ;;  %v2800_v6 = vld [vmem:[#allocation3 + $0x84] sm:$0xf] }
 0x26c   : > { %1708 = vmatpush.bf16.msrb.mxu2 %v2548_v42  ;;  %v2819_v10 = vld [vmem:[#allocation3 + $0x114] sm:$0xf0]  ;;  %v2681_v18 = vld [vmem:[#allocation3 + $0x118] sm:$0xf0]  ;;  %v2609_v41 = vld [vmem:[#allocation3 + $0x88] sm:$0xf0]  ;;  %v2620_v42 = vor.u32 %v2802_v3, %v2617_v2 }
 0x26d   : > { %1263 = vst [vmem:[#allocation3 + $0xb8] sm:$0xff] %v1259_v8  ;;  %v2680_v19 = vor.u32 %v2819_v10, %v2679_v22  ;;  %v2684_v26 = vor.u32 %v2818_v16, %v2681_v18 }
 0x26e   : > { %1667 = vmatmul.bf16.vlgmr.msra.gmra.mxu3 %v2532_v5 }
 0x26f   : > { %1709 = vmatmul.bf16.vlgmr.msrb.gmra.mxu2 %v2532_v5  ;;  %1693 = vmatpush.bf16.msrb.mxu1 %v2680_v19  ;;  %v1225_v45 = vpop.permute.xlu1 %1224  ;;  %v2612_v5 = vor.u32 %v2800_v6, %v2609_v41  ;;  %v1453_v19 = vpop.permute.xlu0 %1452 }
 0x270   : > { %1735 = vmatpush.bf16.msrb.mxu3 %v2684_v26  ;;  %v1233_v23 = vsel %vm1232_vm9, %v3958_v33, %v1225_v45  ;;  %v1237_v24 = vsel %vm1232_vm9, %v1225_v45, %v3958_v33  ;;  %v2657_v33 = vld [vmem:[#allocation3 + $0xe8] sm:$0xf0] }
 0x271   : > { %v1248_v29 = vmul.f32 %v3954_v60, %v1233_v23  ;;  %v1249_v0 = vmul.f32 %v3956_v31, %v1237_v24  ;;  %v2660_v7 = vor.u32 %v2812_v13, %v2657_v33  ;;  %v2649_v31 = vld [vmem:[#allocation3 + $0xd8] sm:$0xf0] }
 0x272   : > { %v2652_v15 = vor.u32 %v2810_v9, %v2649_v31 }
 0x273   : > { %v1256_v37 = vpack.c.bf16 %v1249_v0, %v1248_v29  ;;  %1694 = vmatpush.bf16.msrb.mxu1 %v2672_v11 }
 0x274   : > { %1736 = vmatpush.bf16.msrb.mxu3 %v2676_v34  ;;  %v2807_v38 = vld [vmem:[#allocation3 + $0xb4] sm:$0xf0]  ;;  %v2633_v49 = vld [vmem:[#allocation3 + $0xb8] sm:$0xf0] }
 0x275   : > { %1260 = vst [vmem:[#allocation3 + $0xa0] sm:$0xff] %v1256_v37  ;;  %v2632_v60 = vor.u32 %v2807_v38, %v2631_v14  ;;  %v2636_v61 = vor.u32 %v2806_v51, %v2633_v49 }
 0x276   : > { %2685 = vmatmul.msk.bf16.vlgmr.msrb.gmra.mxu1 %vm1655_vm10, %v2540_v32 }
 0x277   : > { %1715 = vmatpush.bf16.msra.mxu1 %v2668_v36  ;;  %1677 = vmatpush.bf16.msrb.mxu0 %v2632_v60 }
 0x27b   : > { %1716 = vmatpush.bf16.msra.mxu1 %v2660_v7 }
 0x27c   : > { %v2623_v50 = vld [vmem:[#allocation3 + $0xa0] sm:$0xf]  ;;  %v2804_v59 = vld [vmem:[#allocation3 + $0xa4] sm:$0xf] }
 0x27d   : > { %v2624_v52 = vor.u32 %v2805_v17, %v2623_v50  ;;  %v2628_v63 = vor.u32 %v2804_v59, %v2625_v35 }
 0x27e   : > { %2686 = vmatmul.msk.bf16.vlgmr.msrb.gmra.mxu3 %vm1655_vm10, %v2540_v32 }
 0x27f   : > { %1717 = vmatpush.bf16.msra.mxu1 %v2652_v15  ;;  %1678 = vmatpush.bf16.msrb.mxu0 %v2624_v52 }
 0x283   : > { %1718 = vmatpush.bf16.msra.mxu1 %v2644_v48  ;;  %1679 = vmatpush.bf16.msrb.mxu0 %v2616_v57 }
 0x287   : > { %1719 = vmatpush.bf16.msra.mxu1 %v2636_v61  ;;  %1680 = vmatpush.bf16.msrb.mxu0 %v2608_v58 }
 0x28a   : > { %1681 = vmatmul.bf16.vlgmr.msrb.gmra.mxu0 %v2536_v1 }
 0x28b   : > { %1720 = vmatpush.bf16.msra.mxu1 %v2628_v63 }
 0x28f   : > { %1721 = vmatpush.bf16.msra.mxu1 %v2620_v42 }
 0x293   : > { %1722 = vmatpush.bf16.msra.mxu1 %v2612_v5 }
 0x296   : > { %1723 = vmatmul.bf16.vlgmr.msra.gmra.mxu1 %v2536_v1 }
 0x2ce   : > { %v1458_v45 = vpop.permute.xlu1 %1457 }
 0x2f1   : > { %v1668_v8 = vpop.f32.mrf.mxu3 }
 0x2f2   : > { %v1710_v26 = vpop.f32.mrf.mxu2  ;;  %v1669_v30 = vadd.f32 %v1668_v8, %v1453_v19 }
 0x2f3   : > { %v1696_v22 = vpop.f32.mrf.mxu1  ;;  %v1711_v20 = vadd.f32 %v1710_v26, %v1453_v19 }
 0x2f9   : > { %v1670_v10 = vpop.f32.mrf.mxu3 }
 0x2fa   : > { %v1671_v25 = vadd.f32 %v1670_v10, %v1458_v45  ;;  %v1712_v34 = vpop.f32.mrf.mxu2 }
 0x2fb   : > { %v1698_v18 = vpop.f32.mrf.mxu1  ;;  %v1713_v37 = vadd.f32 %v1712_v34, %v1458_v45 }
 0x301   : > { %v1738_v21 = vpop.f32.mrf.mxu3 }
 0x307   : > { %v1682_v16 = vpop.f32.mrf.mxu0 }
 0x308   : > { %v1683_v46 = vadd.f32 %v1682_v16, %v1669_v30 }
 0x309   : > { %v1740_v38 = vpop.f32.mrf.mxu3 }
 0x30a   : > { %v1697_v29 = vadd.f32 %v1696_v22, %v1683_v46 }
 0x30c   : > { %v1751_v43 = vmul.f32 %v4022_v4, %v1697_v29 }
 0x30f   : > { %v1684_v23 = vpop.f32.mrf.mxu0 }
 0x310   : > { %v1685_v0 = vadd.f32 %v1684_v23, %v1671_v25  ;;  %v1743_v23 = vld [vmem:[%s4340_s22] sm:$0xff]  ;;  %v1745_v25 = vld [vmem:[%s4340_s22 + $0x10] sm:$0xff] }
 0x312   : > { %v1699_v32 = vadd.f32 %v1698_v18, %v1685_v0  ;;  %v1747_v0 = vld [vmem:[%s4341_s14] sm:$0xff] }
 0x313   : > { %v1724_v24 = vpop.f32.mrf.mxu1 }
 0x314   : > { %v1725_v28 = vadd.f32 %v1724_v24, %v1711_v20  ;;  %v1753_v60 = vmul.f32 0.0, %v1699_v32  ;;  %v1744_v24 = vld [vmem:[%s4340_s22 + $0x8] sm:$0xff] }
 0x316   : > { %v1739_v11 = vadd.f32 %v1738_v21, %v1725_v28  ;;  %v1746_v28 = vld [vmem:[%s4340_s22 + $0x18] sm:$0xff] }
 0x318   : > { %v1752_v36 = vmul.f32 %v4022_v4, %v1739_v11 }
 0x31a   : > { %v1755_v14 = vadd.f32 %v1752_v36, %v1751_v43  ;;  %v1748_v43 = vld [vmem:[%s4341_s14 + $0x8] sm:$0xff] }
 0x31b   : > { %v1726_v13 = vpop.f32.mrf.mxu1 }
 0x31c   : > { %v1727_v33 = vadd.f32 %v1726_v13, %v1713_v37  ;;  %v1756_v9 = vadd.f32 %v1755_v14, %v1753_v60  ;;  %v1750_v37 = vld [vmem:[%s4341_s14 + $0x18] sm:$0xff] }
 0x31e   : > { %v1741_v7 = vadd.f32 %v1740_v38, %v1727_v33 }
 0x320   : > { %v1754_v31 = vmul.f32 0.0, %v1741_v7 }
 0x322   : > { %v1757_v15 = vadd.f32 %v1756_v9, %v1754_v31 }
 0x324   : > { %1758 = vadd.xlane.f32.xlu2 %v1757_v15 }
 0x397   : > { %v1759_v17 = vpop.xlane.xlu2 %1758 }
 0x398   : > { %v1760_v39 = vrot.slane %v1759_v17, 4 }
 0x39a   : > { %v1761_v44 = vadd.f32 %v1760_v39, %v1759_v17 }
 0x39c   : > { %v1762_v50 = vrot.slane %v1761_v44, 2 }
 0x39e   : > { %v1763_v52 = vadd.f32 %v1762_v50, %v1761_v44 }
 0x3a0   : > { %v1764_v48 = vrot.slane %v1763_v52, 1 }
 0x3a2   : > { %v1765_v53 = vadd.f32 %v1764_v48, %v1763_v52  ;;  %v2054_v48 = vld [vmem:[%s4348_s27] sm:$0xff] }
 0x3a4   : > { %2841 = vpush %v1765_v53 }
 0x3d5   : > { %s2842_s9 = spop %2841 }
 0x3d6   : > { %v1767_v49 = vstv %s2842_s9 }
 0x3d7   : > { %v1768_v54 = vmul.f32 0.0009765625, %v1767_v49 }
 0x3d9   : > { %v1769_v55 = vsub.f32 %v1697_v29, %v1768_v54  ;;  %v1770_v56 = vsub.f32 %v1739_v11, %v1768_v54  ;;  %v1771_v57 = vsub.f32 %v1699_v32, %v1768_v54  ;;  %v1772_v51 = vsub.f32 %v1741_v7, %v1768_v54  ;;  %v1749_v32 = vld [vmem:[%s4341_s14 + $0x10] sm:$0xff]  ;;  %v4088_v54 = vld [vmem:[#allocation9 + $0xc] sm:$0x3] }
 0x3db   : > { %v1773_v61 = vmul.f32 %v4022_v4, %v1769_v55  ;;  %v1774_v35 = vmul.f32 %v4022_v4, %v1770_v56  ;;  %v1775_v58 = vmul.f32 0.0, %v1771_v57  ;;  %v1776_v59 = vmul.f32 0.0, %v1772_v51 }
 0x3dd   : > { %v1777_v40 = vmul.f32 %v1773_v61, %v1773_v61  ;;  %v1778_v62 = vmul.f32 %v1774_v35, %v1774_v35  ;;  %v1779_v63 = vmul.f32 %v1775_v58, %v1775_v58  ;;  %v1780_v2 = vmul.f32 %v1776_v59, %v1776_v59 }
 0x3df   : > { %v1781_v1 = vadd.f32 %v1778_v62, %v1777_v40 }
 0x3e1   : > { %v1782_v3 = vadd.f32 %v1781_v1, %v1779_v63  ;;  %v2055_v63 = vld [vmem:[%s4348_s27 + $0x8] sm:$0xff] }
 0x3e3   : > { %v1783_v6 = vadd.f32 %v1782_v3, %v1780_v2 }
 0x3e5   : > { %1784 = vadd.xlane.f32.xlu0 %v1783_v6  ;;  %v1994_v6 = vld [vmem:[#allocation9 + $0xe] sm:$0x3] }
 0x458   : > { %v1785_v41 = vpop.xlane.xlu0 %1784 }
 0x459   : > { %v1786_v42 = vrot.slane %v1785_v41, 4 }
 0x45b   : > { %v1787_v5 = vadd.f32 %v1786_v42, %v1785_v41  ;;  %v1996_v41 = vperm.slane %v1994_v6, 0  ;;  %v1997_v42 = vperm.slane %v1994_v6, 1 }
 0x45d   : > { %v1788_v8 = vrot.slane %v1787_v5, 2 }
 0x45f   : > { %v1789_v22 = vadd.f32 %v1788_v8, %v1787_v5 }
 0x461   : > { %v1790_v10 = vrot.slane %v1789_v22, 1 }
 0x463   : > { %v1791_v16 = vadd.f32 %v1790_v10, %v1789_v22 }
 0x465   : > { %2843 = vpush %v1791_v16 }
 0x496   : > { %s2844_s23 = spop %2843 }
 0x497   : > { %v1793_v18 = vstv %s2844_s23  ;;  %s4345_s23 = smov 16  }
 0x498   : > { %v1794_v19 = vmul.f32 0.0009765625, %v1793_v18 }
 0x49a   : > { %v1795_v26 = vadd.f32 1e-05, %v1794_v19 }
 0x49c   : > { %2977 = vrsqrt.f32 %v1795_v26  ;;  %vm1802_vm13 = vweird.f32 %v1795_v26 }
 0x4a2   : > { %v2978_v30 = vpop.eup %2977 }
 0x4a3   : > { %v1797_v27 = vmul.f32 %v2978_v30, %v1795_v26  ;;  %vm1803_vm12 = vweird.f32 %v2978_v30  ;;  %v4116_v26 = vld [vmem:[#allocation9 + $0x4] sm:$0x3] }
 0x4a4   : > { %vm1804_vm14 = vmor %vm1802_vm13, %vm1803_vm12 }
 0x4a5   : > { %v1798_v45 = vmul.f32 %v2978_v30, %v1797_v27  ;;  %v1888_v27 = vperm.slane %v4116_v26, 0 }
 0x4a7   : > { %v1799_v20 = vmul.f32 0.5, %v1798_v45  ;;  %v1889_v45 = vperm.slane %v4116_v26, 1 }
 0x4a9   : > { %v1800_v46 = vsub.f32 1.5, %v1799_v20 }
 0x4ab   : > { %v1801_v21 = vmul.f32 %v2978_v30, %v1800_v46 }
 0x4ad   : > { %v1805_v29 = vsel %vm1804_vm14, %v2978_v30, %v1801_v21 }
 0x4ae   : > { %v1806_v11 = vmul.f32 %v1805_v29, %v1769_v55  ;;  %v1807_v12 = vmul.f32 %v1805_v29, %v1770_v56  ;;  %v1808_v34 = vmul.f32 %v1805_v29, %v1771_v57  ;;  %v1809_v36 = vmul.f32 %v1805_v29, %v1772_v51 }
 0x4af   : > { %v1970_v56 = vperm.slane %v4088_v54, 0  ;;  %v1971_v57 = vperm.slane %v4088_v54, 1 }
 0x4b0   : > { %v1810_v13 = vmul.f32 %v1806_v11, %v1743_v23  ;;  %v1811_v33 = vmul.f32 %v1807_v12, %v1744_v24  ;;  %v1812_v14 = vmul.f32 %v1808_v34, %v1745_v25  ;;  %v1813_v38 = vmul.f32 %v1809_v36, %v1746_v28  ;;  %v4132_v34 = vld [vmem:[#allocation9 + $0x2] sm:$0x3] }
 0x4b2   : > { %v1814_v60 = vadd.f32 %v1810_v13, %v1747_v0  ;;  %v1815_v7 = vadd.f32 %v1811_v33, %v1748_v43  ;;  %v1816_v31 = vadd.f32 %v1812_v14, %v1749_v32  ;;  %v1817_v9 = vadd.f32 %v1813_v38, %v1750_v37 }
 0x4b3   : > { %v1862_v32 = vperm.slane %v4132_v34, 0  ;;  %v1863_v37 = vperm.slane %v4132_v34, 1 }
 0x4b4   : > { %v1818_v15 = vmax.f32 %v1814_v60, 0.0  ;;  %v1819_v17 = vmax.f32 %v1815_v7, 0.0  ;;  %v1820_v39 = vmax.f32 %v1816_v31, 0.0  ;;  %v1821_v44 = vmax.f32 %v1817_v9, 0.0 }
 0x4b6   : > { %1962 = vrot.lane.b32.xlu0 %v1821_v44, %s3291_s19  ;;  %1958 = vrot.lane.b32.xlu2 %v1820_v39, %s3291_s19  ;;  %v1926_v50 = vpack.c.bf16 %v1819_v17, %v1818_v15  ;;  %v1927_v52 = vpack.c.bf16 %v1821_v44, %v1820_v39 }
 0x4b7   : > { %1982 = vrot.lane.b32.xlu1 %v1818_v15, %s3289_s25 }
 0x4b8   : > { %1928 = vst [vmem:[#allocation3 + $0x40] sm:$0xff] %v1926_v50 }
 0x4b9   : > { %1929 = vst [vmem:[#allocation3 + $0x48] sm:$0xff] %v1927_v52 }
 0x4be   : > { %1936 = vrot.lane.b32.xlu0 %v1821_v44, %s4342_s26  ;;  %1934 = vrot.lane.b32.xlu2 %v1819_v17, %s4342_s26 }
 0x4bf   : > { %1984 = vrot.lane.b32.xlu1 %v1820_v39, %s3289_s25 }
 0x4c6   : > { %1904 = vrot.lane.b32.xlu0 %v1819_v17, %s4343_s4  ;;  %1902 = vrot.lane.b32.xlu2 %v1820_v39, %s4343_s4 }
 0x4c7   : > { %1986 = vrot.lane.b32.xlu1 %v1819_v17, %s3289_s25 }
 0x4ce   : > { %1876 = vrot.lane.b32.xlu0 %v1820_v39, %s4344_s28  ;;  %1874 = vrot.lane.b32.xlu2 %v1818_v15, %s4344_s28 }
 0x4cf   : > { %1988 = vrot.lane.b32.xlu1 %v1821_v44, %s3289_s25 }
 0x4d6   : > { %1848 = vrot.lane.b32.xlu0 %v1818_v15, %s4345_s23  ;;  %1880 = vrot.lane.b32.xlu2 %v1821_v44, %s4344_s28 }
 0x4d7   : > { %1956 = vrot.lane.b32.xlu1 %v1818_v15, %s3291_s19 }
 0x4de   : > { %1854 = vrot.lane.b32.xlu0 %v1821_v44, %s4345_s23  ;;  %1852 = vrot.lane.b32.xlu2 %v1819_v17, %s4345_s23 }
 0x4df   : > { %1960 = vrot.lane.b32.xlu1 %v1819_v17, %s3291_s19  ;;  %s601_s19 = scalar_lea.vmem [#allocation16], %s4350_s18 }
 0x4e0   : > { %s2320_s9 = sshll.u32 %s601_s19, 4  ;;  %s2321_s9 = int_to_ptr.vmem [resolvable:$true] %s2320_s9 }
 0x4e6   : > { %1826 = vrot.lane.b32.xlu0 %v1819_v17, %s4346_s10  ;;  %1824 = vrot.lane.b32.xlu2 %v1820_v39, %s4346_s10 }
 0x4e7   : > { %1930 = vrot.lane.b32.xlu1 %v1818_v15, %s4342_s26 }
 0x4ee   : > { %2010 = vrot.lane.b32.xlu0 %v1820_v39, %s4347_s5  ;;  %2008 = vrot.lane.b32.xlu2 %v1818_v15, %s4347_s5 }
 0x4ef   : > { %1932 = vrot.lane.b32.xlu1 %v1820_v39, %s4342_s26 }
 0x4f6   : > { %2058 = vperm.xlu0 %2975, %v2054_v48   ;;  %2014 = vrot.lane.b32.xlu2 %v1821_v44, %s4347_s5 }
 0x4f7   : > { %1900 = vrot.lane.b32.xlu1 %v1818_v15, %s4343_s4 }
 0x4ff   : > { %1906 = vrot.lane.b32.xlu1 %v1821_v44, %s4343_s4  ;;  %s2840_s4 = sshll.u32 %s3395_s20, 5 }
 0x507   : > { %1878 = vrot.lane.b32.xlu1 %v1819_v17, %s4344_s28 }
 0x50f   : > { %1850 = vrot.lane.b32.xlu1 %v1820_v39, %s4345_s23 }
 0x510   : > { %v1959_v53 = vpop.permute.xlu2 %1958 }
 0x517   : > { %1822 = vrot.lane.b32.xlu1 %v1818_v15, %s4346_s10 }
 0x518   : > { %v4085_v49 = vpop.permute.xlu2 %1934 }
 0x51f   : > { %1828 = vrot.lane.b32.xlu1 %v1821_v44, %s4346_s10 }
 0x520   : > { %v4090_v55 = vpop.permute.xlu2 %1902 }
 0x527   : > { %2012 = vrot.lane.b32.xlu1 %v1819_v17, %s4347_s5  ;;  %s4349_s5 = sld [smem:[#allocation31_spill]] }
 0x528   : > { %v1963_v51 = vpop.permute.xlu0 %1962  ;;  %v4106_v1 = vpop.permute.xlu2 %1874 }
 0x529   : > { %v1965_v61 = vsel %vm1280_vm7, %v1959_v53, %v1963_v51  ;;  %v1967_v35 = vsel %vm1280_vm7, %v1963_v51, %v1959_v53  ;;  %v1983_v58 = vpop.permute.xlu1 %1982 }
 0x52a   : > { %v1976_v59 = vmul.f32 %v1970_v56, %v1965_v61  ;;  %v1977_v40 = vmul.f32 %v1971_v57, %v1967_v35 }
 0x52c   : > { %v1979_v62 = vpack.c.bf16 %v1977_v40, %v1976_v59  ;;  %v1942_v59 = vld [vmem:[#allocation9 + $0xa] sm:$0x3] }
 0x52d   : > { %s2319_s25 = scalar_lea.hbm %s4349_s5, %s2840_s4  ;;  %s3211_s18 = scalar_lea.hbm %s4349_s5, 64 }
 0x52e   : > { %1981 = vst [vmem:[#allocation3 + $0x68] sm:$0xff] %v1979_v62  ;;  %s2322_s20 = sshll.u32 %s2319_s25, 4  ;;  %s2323_s20 = int_to_ptr.hbm [resolvable:$true] %s2322_s20 }
 0x52f   : > { %2063 = vperm.xlu1 %2976, %v2055_v63   ;;  %v1944_v63 = vperm.slane %v1942_v59, 0 }
 0x530   : > { %v4108_v2 = vpop.permute.xlu0 %1936  ;;  %v1881_v5 = vpop.permute.xlu2 %1880 }
 0x531   : > { %v1985_v3 = vpop.permute.xlu1 %1984 }
 0x538   : > { %v4110_v8 = vpop.permute.xlu0 %1904  ;;  %v1853_v24 = vpop.permute.xlu2 %1852 }
 0x539   : > { %v1987_v22 = vpop.permute.xlu1 %1986 }
 0x53a   : > { %v1990_v10 = vsel %vm1328_vm5, %v1983_v58, %v1987_v22  ;;  %v1992_v16 = vsel %vm1328_vm5, %v1987_v22, %v1983_v58 }
 0x53b   : > { %v2000_v18 = vmul.f32 %v1996_v41, %v1990_v10  ;;  %v2001_v19 = vmul.f32 %v1997_v42, %v1992_v16  ;;  %v2835_v10 = vld [vmem:[#allocation3 + $0x64] sm:$0xf0]  ;;  %v2747_v16 = vld [vmem:[#allocation3 + $0x68] sm:$0xf0] }
 0x53d   : > { %v2004_v30 = vpack.c.bf16 %v2001_v19, %v2000_v18 }
 0x53f   : > { %2006 = vst [vmem:[#allocation3 + $0x70] sm:$0xff] %v2004_v30 }
 0x540   : > { %v1877_v20 = vpop.permute.xlu0 %1876  ;;  %v4144_v31 = vpop.permute.xlu2 %1824 }
 0x541   : > { %v1883_v46 = vsel %vm1128_vm3, %v1877_v20, %v1881_v5  ;;  %v1885_v21 = vsel %vm1128_vm3, %v1881_v5, %v1877_v20  ;;  %v1989_v23 = vpop.permute.xlu1 %1988  ;;  %v4166_v5 = vld [vmem:[#allocation9 + $0x10] sm:$0x3] }
 0x542   : > { %v1894_v25 = vmul.f32 %v1888_v27, %v1885_v21  ;;  %v1895_v28 = vmul.f32 %v1889_v45, %v1883_v46  ;;  %v1991_v29 = vsel %vm1328_vm5, %v1985_v3, %v1989_v23  ;;  %v1993_v0 = vsel %vm1328_vm5, %v1989_v23, %v1985_v3 }
 0x543   : > { %v2002_v11 = vmul.f32 %v1996_v41, %v1991_v29  ;;  %v2003_v12 = vmul.f32 %v1997_v42, %v1993_v0  ;;  %v1945_v3 = vperm.slane %v1942_v59, 1  ;;  %v2022_v18 = vperm.slane %v4166_v5, 0  ;;  %v2830_v59 = vld [vmem:[#allocation3 + $0x44] sm:$0xf] }
 0x544   : > { %v1897_v36 = vpack.c.bf16 %v1895_v28, %v1894_v25  ;;  %v2023_v19 = vperm.slane %v4166_v5, 1 }
 0x545   : > { %v2005_v43 = vpack.c.bf16 %v2003_v12, %v2002_v11 }
 0x546   : > { %1899 = vst [vmem:[#allocation3 + $0x28] sm:$0xff] %v1897_v36  ;;  %v2753_v15 = vld [vmem:[#allocation3 + $0x70] sm:$0xf]  ;;  %v2836_v17 = vld [vmem:[#allocation3 + $0x74] sm:$0xf] }
 0x547   : > { %2007 = vst [vmem:[#allocation3 + $0x78] sm:$0xff] %v2005_v43 }
 0x548   : > { %v1849_v13 = vpop.permute.xlu0 %1848  ;;  %v4156_v62 = vpop.permute.xlu2 %2008 }
 0x549   : > { %v1856_v33 = vsel %vm1080_vm4, %v1849_v13, %v1853_v24  ;;  %v1858_v14 = vsel %vm1080_vm4, %v1853_v24, %v1849_v13  ;;  %v1957_v38 = vpop.permute.xlu1 %1956 }
 0x54a   : > { %v1866_v60 = vmul.f32 %v1862_v32, %v1858_v14  ;;  %v1867_v7 = vmul.f32 %v1863_v37, %v1856_v33  ;;  %v1912_v33 = vld [vmem:[#allocation9 + $0x6] sm:$0x3] }
 0x54c   : > { %v1870_v9 = vpack.c.bf16 %v1867_v7, %v1866_v60  ;;  %v1915_v60 = vperm.slane %v1912_v33, 1 }
 0x54e   : > { %1872 = vst [vmem:[#allocation3 + $0x10] sm:$0xff] %v1870_v9  ;;  %v2837_v39 = vld [vmem:[#allocation3 + $0x74] sm:$0xf0]  ;;  %v2755_v44 = vld [vmem:[#allocation3 + $0x78] sm:$0xf0] }
 0x54f   : > { %v2754_v50 = vor.u32 %v2837_v39, %v2753_v15  ;;  %v2758_v52 = vor.u32 %v2836_v17, %v2755_v44 }
 0x550   : > { %v4146_v48 = vpop.permute.xlu0 %1854  ;;  %v2015_v23 = vpop.permute.xlu2 %2014 }
 0x551   : > { %2168 = vmatpush.bf16.msra.mxu0 %v2754_v50  ;;  %2196 = vmatpush.bf16.msra.mxu3 %v2758_v52  ;;  %v1961_v53 = vpop.permute.xlu1 %1960 }
 0x552   : > { %v1964_v51 = vsel %vm1280_vm7, %v1957_v38, %v1961_v53  ;;  %v1966_v61 = vsel %vm1280_vm7, %v1961_v53, %v1957_v38  ;;  %v1914_v38 = vperm.slane %v1912_v33, 0 }
 0x553   : > { %v1974_v35 = vmul.f32 %v1970_v56, %v1964_v51  ;;  %v1975_v58 = vmul.f32 %v1971_v57, %v1966_v61 }
 0x555   : > { %v1978_v40 = vpack.c.bf16 %v1975_v58, %v1974_v35  ;;  %v2729_v35 = vld [vmem:[#allocation3 + $0x40] sm:$0xf]  ;;  %v2831_v58 = vld [vmem:[#allocation3 + $0x44] sm:$0xf0] }
 0x557   : > { %1980 = vst [vmem:[#allocation3 + $0x60] sm:$0xff] %v1978_v40  ;;  %v2731_v40 = vld [vmem:[#allocation3 + $0x48] sm:$0xf0] }
 0x558   : > { %v4158_v6 = vpop.permute.xlu0 %1826 }
 0x559   : > { %v1931_v41 = vpop.permute.xlu1 %1930 }
 0x55a   : > { %v1938_v42 = vsel %vm1232_vm9, %v1931_v41, %v4085_v49  ;;  %v1940_v56 = vsel %vm1232_vm9, %v4085_v49, %v1931_v41 }
 0x55b   : > { %v1948_v54 = vmul.f32 %v1944_v63, %v1938_v42  ;;  %v1949_v57 = vmul.f32 %v1945_v3, %v1940_v56  ;;  %v2730_v56 = vor.u32 %v2831_v58, %v2729_v35 }
 0x55d   : > { %v1952_v22 = vpack.c.bf16 %v1949_v57, %v1948_v54  ;;  %v2734_v54 = vor.u32 %v2830_v59, %v2731_v40 }
 0x55e   : > { %v2745_v30 = vld [vmem:[#allocation3 + $0x60] sm:$0xf]  ;;  %v2834_v20 = vld [vmem:[#allocation3 + $0x64] sm:$0xf] }
 0x55f   : > { %1954 = vst [vmem:[#allocation3 + $0x50] sm:$0xff] %v1952_v22  ;;  %v2746_v46 = vor.u32 %v2835_v10, %v2745_v30  ;;  %v2750_v21 = vor.u32 %v2834_v20, %v2747_v16 }
 0x560   : > { %v2011_v24 = vpop.permute.xlu0 %2010 }
 0x561   : > { %v2017_v49 = vsel %vm1376_vm8, %v2011_v24, %v2015_v23  ;;  %v2019_v25 = vsel %vm1376_vm8, %v2015_v23, %v2011_v24  ;;  %2169 = vmatpush.bf16.msra.mxu0 %v2746_v46  ;;  %2197 = vmatpush.bf16.msra.mxu3 %v2750_v21  ;;  %v1933_v28 = vpop.permute.xlu1 %1932 }
 0x562   : > { %v2028_v29 = vmul.f32 %v2022_v18, %v2017_v49  ;;  %v2029_v0 = vmul.f32 %v2023_v19, %v2019_v25  ;;  %v1939_v11 = vsel %vm1232_vm9, %v1933_v28, %v4108_v2  ;;  %v1941_v12 = vsel %vm1232_vm9, %v4108_v2, %v1933_v28 }
 0x563   : > { %v1950_v36 = vmul.f32 %v1944_v63, %v1939_v11  ;;  %v1951_v43 = vmul.f32 %v1945_v3, %v1941_v12  ;;  %v2827_v11 = vld [vmem:[#allocation3 + $0x24] sm:$0xf0] }
 0x564   : > { %v2031_v13 = vpack.c.bf16 %v2029_v0, %v2028_v29  ;;  %v1834_v29 = vld [vmem:[#allocation9] sm:$0x3] }
 0x565   : > { %v1953_v14 = vpack.c.bf16 %v1951_v43, %v1950_v36  ;;  %v2715_v43 = vld [vmem:[#allocation3 + $0x28] sm:$0xf0]  ;;  %v1837_v33 = vperm.slane %v1834_v29, 1 }
 0x566   : > { %2033 = vst [vmem:[#allocation3 + $0x88] sm:$0xff] %v2031_v13  ;;  %v2737_v44 = vld [vmem:[#allocation3 + $0x50] sm:$0xf]  ;;  %v2832_v52 = vld [vmem:[#allocation3 + $0x54] sm:$0xf]  ;;  %v1836_v13 = vperm.slane %v1834_v29, 0 }
 0x567   : > { %1955 = vst [vmem:[#allocation3 + $0x58] sm:$0xff] %v1953_v14 }
 0x569   : > { %v1901_v7 = vpop.permute.xlu1 %1900 }
 0x56a   : > { %v1908_v9 = vsel %vm1176_vm2, %v1901_v7, %v4110_v8  ;;  %v1910_v15 = vsel %vm1176_vm2, %v4110_v8, %v1901_v7 }
 0x56b   : > { %v1918_v17 = vmul.f32 %v1914_v38, %v1910_v15  ;;  %v1919_v2 = vmul.f32 %v1915_v60, %v1908_v9  ;;  %v2705_v9 = vld [vmem:[#allocation3 + $0x10] sm:$0xf] }
 0x56d   : > { %v1922_v39 = vpack.c.bf16 %v1919_v2, %v1918_v17  ;;  %v2824_v17 = vld [vmem:[#allocation3 + $0x14] sm:$0xf]  ;;  %v2839_v47 = vld [vmem:[#allocation3 + $0x84] sm:$0xf0] }
 0x56e   : > { %v2833_v50 = vld [vmem:[#allocation3 + $0x54] sm:$0xf0]  ;;  %v2739_v53 = vld [vmem:[#allocation3 + $0x58] sm:$0xf0] }
 0x56f   : > { %1924 = vst [vmem:[#allocation3 + $0x30] sm:$0xff] %v1922_v39  ;;  %v2738_v51 = vor.u32 %v2833_v50, %v2737_v44  ;;  %v2742_v61 = vor.u32 %v2832_v52, %v2739_v53 }
 0x571   : > { %2170 = vmatpush.bf16.msra.mxu0 %v2738_v51  ;;  %2198 = vmatpush.bf16.msra.mxu3 %v2742_v61  ;;  %v1907_v63 = vpop.permute.xlu1 %1906 }
 0x572   : > { %v1909_v8 = vsel %vm1176_vm2, %v4090_v55, %v1907_v63  ;;  %v1911_v3 = vsel %vm1176_vm2, %v1907_v63, %v4090_v55 }
 0x573   : > { %v1920_v41 = vmul.f32 %v1914_v38, %v1911_v3  ;;  %v1921_v42 = vmul.f32 %v1915_v60, %v1909_v8  ;;  %v2689_v3 = vld [vmem:[#allocation12] sm:$0xf] }
 0x575   : > { %v1923_v57 = vpack.c.bf16 %v1921_v42, %v1920_v41  ;;  %2171 = vmatpush.bf16.msra.mxu0 %v2730_v56  ;;  %2199 = vmatpush.bf16.msra.mxu3 %v2734_v54  ;;  %v2821_v41 = vld [vmem:[#allocation12 + $0x4] sm:$0xf0] }
 0x576   : > { %v2721_v46 = vld [vmem:[#allocation3 + $0x30] sm:$0xf]  ;;  %v2828_v23 = vld [vmem:[#allocation3 + $0x34] sm:$0xf] }
 0x577   : > { %1925 = vst [vmem:[#allocation3 + $0x38] sm:$0xff] %v1923_v57 }
 0x579   : > { %v1879_v22 = vpop.permute.xlu1 %1878 }
 0x57a   : > { %v1882_v10 = vsel %vm1128_vm3, %v4106_v1, %v1879_v22  ;;  %v1884_v16 = vsel %vm1128_vm3, %v1879_v22, %v4106_v1 }
 0x57b   : > { %v1892_v55 = vmul.f32 %v1888_v27, %v1884_v16  ;;  %v1893_v30 = vmul.f32 %v1889_v45, %v1882_v10  ;;  %v2690_v10 = vor.u32 %v2821_v41, %v2689_v3  ;;  %v2763_v16 = vld [vmem:[#allocation3 + $0x88] sm:$0xf0] }
 0x57d   : > { %v1896_v20 = vpack.c.bf16 %v1893_v30, %v1892_v55 }
 0x57e   : > { %v2829_v21 = vld [vmem:[#allocation3 + $0x34] sm:$0xf0]  ;;  %v2723_v24 = vld [vmem:[#allocation3 + $0x38] sm:$0xf0] }
 0x57f   : > { %1898 = vst [vmem:[#allocation3 + $0x20] sm:$0xff] %v1896_v20  ;;  %v2722_v49 = vor.u32 %v2829_v21, %v2721_v46  ;;  %v2726_v25 = vor.u32 %v2828_v23, %v2723_v24  ;;  %v2059_v24 = vpop.permute.xlu0 %2058 }
 0x581   : > { %v1851_v28 = vpop.permute.xlu1 %1850  ;;  %2172 = vmatpush.bf16.msra.mxu0 %v2722_v49  ;;  %2200 = vmatpush.bf16.msra.mxu3 %v2726_v25 }
 0x582   : > { %v1857_v1 = vsel %vm1080_vm4, %v1851_v28, %v4146_v48  ;;  %v1859_v26 = vsel %vm1080_vm4, %v4146_v48, %v1851_v28 }
 0x583   : > { %v1868_v27 = vmul.f32 %v1862_v32, %v1859_v26  ;;  %v1869_v45 = vmul.f32 %v1863_v37, %v1857_v1 }
 0x585   : > { %v1871_v0 = vpack.c.bf16 %v1869_v45, %v1868_v27 }
 0x586   : > { %v2713_v12 = vld [vmem:[#allocation3 + $0x20] sm:$0xf]  ;;  %v2826_v36 = vld [vmem:[#allocation3 + $0x24] sm:$0xf] }
 0x587   : > { %1873 = vst [vmem:[#allocation3 + $0x18] sm:$0xff] %v1871_v0  ;;  %v2714_v14 = vor.u32 %v2827_v11, %v2713_v12  ;;  %v2718_v38 = vor.u32 %v2826_v36, %v2715_v43 }
 0x589   : > { %v1823_v60 = vpop.permute.xlu1 %1822  ;;  %2173 = vmatpush.bf16.msra.mxu0 %v2714_v14  ;;  %2201 = vmatpush.bf16.msra.mxu3 %v2718_v38 }
 0x58a   : > { %v1830_v32 = vsel %vm1033_vm6, %v1823_v60, %v4158_v6  ;;  %v1832_v34 = vsel %vm1033_vm6, %v4158_v6, %v1823_v60 }
 0x58b   : > { %v1840_v37 = vmul.f32 %v1836_v13, %v1832_v34  ;;  %v1841_v48 = vmul.f32 %v1837_v33, %v1830_v32 }
 0x58d   : > { %v1844_v7 = vpack.c.bf16 %v1841_v48, %v1840_v37 }
 0x58e   : > { %v2825_v15 = vld [vmem:[#allocation3 + $0x14] sm:$0xf0]  ;;  %v2707_v2 = vld [vmem:[#allocation3 + $0x18] sm:$0xf0] }
 0x58f   : > { %1846 = vst [vmem:[#allocation3] sm:$0xff] %v1844_v7  ;;  %v2706_v39 = vor.u32 %v2825_v15, %v2705_v9  ;;  %v2710_v44 = vor.u32 %v2824_v17, %v2707_v2 }
 0x591   : > { %v1829_v50 = vpop.permute.xlu1 %1828  ;;  %2174 = vmatpush.bf16.msra.mxu0 %v2706_v39  ;;  %2202 = vmatpush.bf16.msra.mxu3 %v2710_v44 }
 0x592   : > { %v1831_v52 = vsel %vm1033_vm6, %v4144_v31, %v1829_v50  ;;  %v1833_v6 = vsel %vm1033_vm6, %v1829_v50, %v4144_v31 }
 0x593   : > { %v1842_v53 = vmul.f32 %v1836_v13, %v1833_v6  ;;  %v1843_v51 = vmul.f32 %v1837_v33, %v1831_v52 }
 0x595   : > { %v1845_v61 = vpack.c.bf16 %v1843_v51, %v1842_v53 }
 0x596   : > { %v2697_v8 = vld [vmem:[#allocation3] sm:$0xf]  ;;  %v2822_v56 = vld [vmem:[#allocation3 + $0x4] sm:$0xf] }
 0x597   : > { %1847 = vst [vmem:[#allocation3 + $0x8] sm:$0xff] %v1845_v61 }
 0x599   : > { %v2013_v35 = vpop.permute.xlu1 %2012 }
 0x59a   : > { %v2016_v58 = vsel %vm1376_vm8, %v4156_v62, %v2013_v35  ;;  %v2018_v59 = vsel %vm1376_vm8, %v2013_v35, %v4156_v62  ;;  %v2820_v62 = vld [vmem:[#allocation12 + $0x4] sm:$0xf] }
 0x59b   : > { %v2026_v40 = vmul.f32 %v2022_v18, %v2016_v58  ;;  %v2027_v63 = vmul.f32 %v2023_v19, %v2018_v59  ;;  %v2691_v18 = vld [vmem:[#allocation12 + $0x8] sm:$0xf0] }
 0x59c   : > { %v2694_v20 = vor.u32 %v2820_v62, %v2691_v18 }
 0x59d   : > { %v2030_v31 = vpack.c.bf16 %v2027_v63, %v2026_v40 }
 0x59e   : > { %v2823_v42 = vld [vmem:[#allocation3 + $0x4] sm:$0xf0]  ;;  %v2699_v54 = vld [vmem:[#allocation3 + $0x8] sm:$0xf0] }
 0x59f   : > { %2032 = vst [vmem:[#allocation3 + $0x80] sm:$0xff] %v2030_v31  ;;  %v2698_v57 = vor.u32 %v2823_v42, %v2697_v8  ;;  %v2702_v22 = vor.u32 %v2822_v56, %v2699_v54 }
 0x5a1   : > { %2175 = vmatpush.bf16.msra.mxu0 %v2698_v57  ;;  %2203 = vmatpush.bf16.msra.mxu3 %v2702_v22  ;;  %v2064_v27 = vpop.permute.xlu1 %2063 }
 0x5a4   : > { %2176 = vmatmul.bf16.vlgmr.msra.gmra.mxu0 %v2690_v10  ;;  %2204 = vmatmul.bf16.vlgmr.msra.gmra.mxu3 %v2690_v10 }
 0x5a6   : > { %v2761_v5 = vld [vmem:[#allocation3 + $0x80] sm:$0xf]  ;;  %v2838_v19 = vld [vmem:[#allocation3 + $0x84] sm:$0xf] }
 0x5a7   : > { %v2762_v55 = vor.u32 %v2839_v47, %v2761_v5  ;;  %v2766_v30 = vor.u32 %v2838_v19, %v2763_v16 }
 0x5a9   : > { %2189 = vmatpush.bf16.msra.mxu2 %v2762_v55  ;;  %2217 = vmatpush.bf16.msrb.mxu1 %v2766_v30 }
 0x5ac   : > { %2767 = vmatmul.msk.bf16.vlgmr.msra.gmra.mxu2 %vm644_vm0, %v2694_v20  ;;  %2768 = vmatmul.msk.bf16.vlgmr.msrb.gmra.mxu1 %vm644_vm0, %v2694_v20 }
 0x621   : > { %v2177_v21 = vpop.f32.mrf.mxu0 }
 0x622   : > { %v2178_v25 = vadd.f32 %v2177_v21, %v2059_v24  ;;  %v2224_v21 = vld [vmem:[#allocation13] sm:$0xff] }
 0x627   : > { %v2205_v46 = vpop.f32.mrf.mxu3 }
 0x628   : > { %v2206_v28 = vadd.f32 %v2205_v46, %v2059_v24  ;;  %v2226_v24 = vld [vmem:[#allocation13 + $0x10] sm:$0xff] }
 0x629   : > { %v2219_v23 = vpop.f32.mrf.mxu1  ;;  %v2179_v45 = vpop.f32.mrf.mxu0 }
 0x62a   : > { %v2220_v29 = vadd.f32 %v2219_v23, %v2206_v28  ;;  %v2180_v12 = vadd.f32 %v2179_v45, %v2064_v27  ;;  %v2225_v23 = vld [vmem:[#allocation13 + $0x8] sm:$0xff]  ;;  %v2228_v28 = vld [vmem:[#allocation15] sm:$0xff] }
 0x62c   : > { %v2233_v13 = vmul.f32 %v4022_v4, %v2220_v29 }
 0x62f   : > { %v2191_v49 = vpop.f32.mrf.mxu2  ;;  %v2207_v1 = vpop.f32.mrf.mxu3 }
 0x630   : > { %v2192_v26 = vadd.f32 %v2191_v49, %v2178_v25  ;;  %v2208_v0 = vadd.f32 %v2207_v1, %v2064_v27  ;;  %v2227_v49 = vld [vmem:[#allocation13 + $0x18] sm:$0xff] }
 0x631   : > { %v2221_v11 = vpop.f32.mrf.mxu1 }
 0x632   : > { %v2232_v36 = vmul.f32 %v4022_v4, %v2192_v26  ;;  %v2222_v33 = vadd.f32 %v2221_v11, %v2208_v0  ;;  %v2230_v0 = vld [vmem:[#allocation15 + $0x10] sm:$0xff]  ;;  %v2231_v11 = vld [vmem:[#allocation15 + $0x18] sm:$0xff] }
 0x634   : > { %v2236_v38 = vadd.f32 %v2233_v13, %v2232_v36  ;;  %v2235_v32 = vmul.f32 0.0, %v2222_v33 }
 0x637   : > { %v2193_v43 = vpop.f32.mrf.mxu2 }
 0x638   : > { %v2194_v14 = vadd.f32 %v2193_v43, %v2180_v12 }
 0x63a   : > { %v2234_v60 = vmul.f32 0.0, %v2194_v14 }
 0x63c   : > { %v2237_v34 = vadd.f32 %v2236_v38, %v2234_v60 }
 0x63e   : > { %v2238_v37 = vadd.f32 %v2237_v34, %v2235_v32 }
 0x640   : > { %2239 = vadd.xlane.f32.xlu2 %v2238_v37 }
 0x6b3   : > { %v2240_v48 = vpop.xlane.xlu2 %2239 }
 0x6b4   : > { %v2241_v7 = vrot.slane %v2240_v48, 4 }
 0x6b6   : > { %v2242_v9 = vadd.f32 %v2241_v7, %v2240_v48 }
 0x6b8   : > { %v2243_v15 = vrot.slane %v2242_v9, 2 }
 0x6ba   : > { %v2244_v17 = vadd.f32 %v2243_v15, %v2242_v9 }
 0x6bc   : > { %v2245_v2 = vrot.slane %v2244_v17, 1 }
 0x6be   : > { %v2246_v39 = vadd.f32 %v2245_v2, %v2244_v17 }
 0x6c0   : > { %2845 = vpush %v2246_v39 }
 0x6f1   : > { %s2846_s7 = spop %2845 }
 0x6f2   : > { %v2248_v44 = vstv %s2846_s7  ;;  %s2308_s7 = scalar_lea.sflag [#allocation6], %s3511_s11 }
 0x6f3   : > { %v2249_v50 = vmul.f32 0.0009765625, %v2248_v44 }
 0x6f5   : > { %v2250_v52 = vsub.f32 %v2192_v26, %v2249_v50  ;;  %v2251_v6 = vsub.f32 %v2220_v29, %v2249_v50  ;;  %v2252_v53 = vsub.f32 %v2194_v14, %v2249_v50  ;;  %v2253_v51 = vsub.f32 %v2222_v33, %v2249_v50  ;;  %v2229_v29 = vld [vmem:[#allocation15 + $0x8] sm:$0xff] }
 0x6f7   : > { %v2254_v61 = vmul.f32 %v4022_v4, %v2250_v52  ;;  %v2255_v35 = vmul.f32 %v4022_v4, %v2251_v6  ;;  %v2256_v58 = vmul.f32 0.0, %v2252_v53  ;;  %v2257_v59 = vmul.f32 0.0, %v2253_v51 }
 0x6f9   : > { %v2258_v40 = vmul.f32 %v2254_v61, %v2254_v61  ;;  %v2259_v63 = vmul.f32 %v2255_v35, %v2255_v35  ;;  %v2260_v31 = vmul.f32 %v2256_v58, %v2256_v58  ;;  %v2261_v3 = vmul.f32 %v2257_v59, %v2257_v59 }
 0x6fb   : > { %v2262_v8 = vadd.f32 %v2259_v63, %v2258_v40 }
 0x6fd   : > { %v2263_v41 = vadd.f32 %v2262_v8, %v2260_v31 }
 0x6ff   : > { %v2264_v42 = vadd.f32 %v2263_v41, %v2261_v3 }
 0x701   : > { %2265 = vadd.xlane.f32.xlu0 %v2264_v42 }
 0x774   : > { %v2266_v56 = vpop.xlane.xlu0 %2265 }
 0x775   : > { %v2267_v54 = vrot.slane %v2266_v56, 4 }
 0x777   : > { %v2268_v57 = vadd.f32 %v2267_v54, %v2266_v56 }
 0x779   : > { %v2269_v22 = vrot.slane %v2268_v57, 2 }
 0x77b   : > { %v2270_v10 = vadd.f32 %v2269_v22, %v2268_v57 }
 0x77d   : > { %v2271_v47 = vrot.slane %v2270_v10, 1 }
 0x77f   : > { %v2272_v62 = vadd.f32 %v2271_v47, %v2270_v10 }
 0x781   : > { %2847 = vpush %v2272_v62 }
 0x7b2   : > { %s2848_s26 = spop %2847 }
 0x7b3   : > { %v2274_v4 = vstv %s2848_s26  ;;  %s3205_s26 = sshra.s32 %s2323_s20, 4  ;;  %s3206_s26 = int_to_ptr.hbm [resolvable:$true] %s3205_s26 }
 0x7b4   : > { %v2275_v18 = vmul.f32 0.0009765625, %v2274_v4  ;;  %s3207_s4 = scalar_lea.hbm %s3206_s26, 32  ;;  %p3212_p7 = scmp.lt.s32.totalorder %s3206_s26, %s4349_s5 }
 0x7b5   : > { %p3208_p1 = scmp.ne.s32.totalorder %s3206_s26, %s3207_s4  ;;  %p3213_p8 = scmp.lt.s32.totalorder %s3211_s18, %s3207_s4 }
 0x7b6   : > { %v2276_v5 = vadd.f32 1e-05, %v2275_v18 }
 0x7b7   : > { %p3209_p5 = pnand %p3208_p1, %p3477_p4  ;;  %p3214_p9 = por %p3213_p8, %p3212_p7 }
 0x7b8   : > { %2979 = vrsqrt.f32 %v2276_v5  ;;  %vm2283_vm0 = vweird.f32 %v2276_v5 }
 0x7b9   : > { %p3210_p12 = pneg %p3209_p5 }
 0x7bb   : > { %p3215_p10 = pnand %p3214_p9, %p3210_p12 }
 0x7be   : > { %v2980_v19 = vpop.eup %2979 }
 0x7bf   : > { %v2278_v16 = vmul.f32 %v2980_v19, %v2276_v5  ;;  %vm2284_vm15 = vweird.f32 %v2980_v19 }
 0x7c0   : > { %vm2285_vm1 = vmor %vm2283_vm0, %vm2284_vm15 }
 0x7c1   : > { %v2279_v55 = vmul.f32 %v2980_v19, %v2278_v16 }
 0x7c3   : > { %v2280_v30 = vmul.f32 0.5, %v2279_v55 }
 0x7c5   : > { %v2281_v20 = vsub.f32 1.5, %v2280_v30 }
 0x7c7   : > { %v2282_v46 = vmul.f32 %v2980_v19, %v2281_v20 }
 0x7c9   : > { %v2286_v25 = vsel %vm2285_vm1, %v2980_v19, %v2282_v46 }
 0x7ca   : > { %v2287_v1 = vmul.f32 %v2286_v25, %v2250_v52  ;;  %v2288_v26 = vmul.f32 %v2286_v25, %v2251_v6  ;;  %v2289_v27 = vmul.f32 %v2286_v25, %v2252_v53  ;;  %v2290_v45 = vmul.f32 %v2286_v25, %v2253_v51 }
 0x7cc   : > { %v2291_v12 = vmul.f32 %v2287_v1, %v2224_v21  ;;  %v2292_v36 = vmul.f32 %v2288_v26, %v2225_v23  ;;  %v2293_v43 = vmul.f32 %v2289_v27, %v2226_v24  ;;  %v2294_v13 = vmul.f32 %v2290_v45, %v2227_v49 }
 0x7ce   : > { %v2295_v33 = vadd.f32 %v2291_v12, %v2228_v28  ;;  %v2296_v14 = vadd.f32 %v2292_v36, %v2229_v29  ;;  %v2297_v38 = vadd.f32 %v2293_v43, %v2230_v0  ;;  %v2298_v60 = vadd.f32 %v2294_v13, %v2231_v11 }
 0x7d0   : > { %v2299_v32 = vmax.f32 %v2295_v33, 0.0  ;;  %v2300_v34 = vmax.f32 %v2296_v14, 0.0  ;;  %v2301_v37 = vmax.f32 %v2297_v38, 0.0  ;;  %v2302_v48 = vmax.f32 %v2298_v60, 0.0 }
 0x7d2   : > { %2303 = vst [vmem:[%s601_s19] sm:$0xff] %v2299_v32 }
 0x7d3   : > { %2304 = vst [vmem:[%s601_s19 + $0x8] sm:$0xff] %v2300_v34 }
 0x7d4   : > { %2305 = vst [vmem:[%s601_s19 + $0x10] sm:$0xff] %v2301_v37 }
 0x7d5   : > { %2306 = vst [vmem:[%s601_s19 + $0x18] sm:$0xff] %v2302_v48 }
 0x7d6   : > { %3218 = shalt.err (!%p3215_p10)
}
 0x7d7   : > { %s3295_s11 = smov 256  }
 0x7d8   : > { %2875 = dma.vmem_to_hbm [thread:$0]  (%p3477_p4), %s2321_s9, 512, %s2323_s20, %s2308_s7, %s3295_s11, %s3295_s11, %s4345_s23  }
 0x7d9 PF: > { %s2337_s19 = sand.u32 1, %s3257_s29   ;;  %p4351_p13 = scmp.ge.s32.totalorder %s3269_s16, 2 }
 0x7da   : > { %s2338_s0 = scalar_lea.sflag [#allocation6], %s2337_s19 }
 0x7db   : > { %p2901_p11 = pnand %p4351_p13, %p3481_p6 }
 0x7dd   : > { %p2902_p0 = pneg %p2901_p11 }
 0x7df   : > { %3252 = dma.done.wait (%p2902_p0), %s2338_s0, 512  }
 0x7e0   : > { %3254 = vsyncadd (%p2902_p0), %s2338_s0, 4294966784  ;;  %p30_p2 = scmp.ge.s32.totalorder %s3451_s6, 4   ;;  %s4352_s29 = smov %s3261_s30 }
 0x7e1   : > { %s4353_s30 = smov %s3265_s15  ;;  %s4354_s15 = smov %s3462_s8 }
 0x7e2   : > { %s4355_s16 = smov %s3451_s6  ;;  %32 = sbr.rel (!%p30_p2) target bundleno = 19 (0x13), region = 158 }
 0x7e7   :  { %2344 = vsyncpa [#allocation5], 1 }
 0x7e8   :  { %2346 = vsyncpa [#allocation5 + $0x1], 1 }
 0x7e9   :  { %2347 = vsyncpa [#allocation8], 1 }
 0x7ea   :  { %2348 = vsyncpa [#allocation11], 1 }
 0x7eb   :  { %2349 = vsyncpa [#allocation14], 1 }
 0x7ec   :  { %2350 = vsyncpa [#allocation6], 1 }
 0x7ed   :  { %2352 = vsyncpa [#allocation6 + $0x1], 1 }

</bundles_post_ra>
